<compile_context>
chip_gen: v7x
topology: tpu7x:2x2x1
jax: 0.10.0
libtpu: 0.0.40
codegen_flags: <defaults>
</compile_context>

<pallas_src>
import jax
import jax.numpy as jnp
from jax.experimental import pallas as pl
from jax.experimental.pallas import tpu as pltpu


# ----------------------------------------------------------------------------
# Fixed model geometry (DeepCAT CNN, input is (N, 1, 20, seq_len) NCHW).
# ----------------------------------------------------------------------------
_AA = 20                        # amino-acid rows (input H)
_C1, _KH1 = 8, 10               # conv1: 1 -> 8 channels, kernel (10, seq_len-8)
_C2, _KH2, _KW2 = 16, 10, 4     # conv2: 8 -> 16 channels, kernel (10, 4)
_OH1 = _AA - _KH1 + 1           # 11
_OW1 = 9                        # seq_len - (seq_len-8) + 1
_PW1 = _OW1 - 1                 # 8 after MaxPool2d((1,2), stride=(1,1))
_OH2 = _OH1 - _KH2 + 1          # 2
_OW2 = _PW1 - _KW2 + 1          # 5
_PW2 = _OW2 - 1                 # 4
_CONV1_COLS = _C1 * _OH1 * _PW1 # 704
_CONV1_PAD = 768                # lane-aligned (6 * 128)
_FLAT = _C2 * _OH2 * _PW2       # 128 (= fc1 in_features = 16*4*2), already aligned
_FC1, _FC2, _NCLS = 50, 10, 2
_OUT_LANES = 128                # lane-dense fused output width

_KP_ORDER = ("w1", "b1", "w2", "b2",
             "fc1_w", "fc1_b", "bn1_s", "bn1_t",
             "fc2_w", "fc2_b", "bn2_s", "bn2_t",
             "fc3_w", "fc3_b")


# ----------------------------------------------------------------------------
# The single fused Pallas kernel
# ----------------------------------------------------------------------------
def _fused_forward_kernel(
        x_ref,
        w1_ref, b1_ref, w2_ref, b2_ref,
        fc1w_ref, fc1b_ref, bn1s_ref, bn1t_ref,
        fc2w_ref, fc2b_ref, bn2s_ref, bn2t_ref,
        fc3w_ref, fc3b_ref,
        out_ref):
    f32 = jnp.float32
    bf16 = jnp.bfloat16

    x = x_ref[...]                                              # (TB, 20*L) bf16

    # conv1 + ReLU + MaxPool(1,2)/s1: one bf16 dot against the concatenated
    # pair of column-shifted expanded conv weights; pool = lane-aligned slice
    # max; shared bias added once after the max.
    c1 = jnp.dot(x, w1_ref[...], preferred_element_type=f32)    # (TB, 1536) f32
    p1 = jnp.maximum(
        jnp.maximum(c1[:, :_CONV1_PAD], c1[:, _CONV1_PAD:]) + b1_ref[...], 0.0)

    # conv2 + ReLU + MaxPool(1,2)/s1, same structure.            # (TB, 768) f32
    c2 = jnp.dot(p1.astype(bf16), w2_ref[...], preferred_element_type=f32)
    p2 = jnp.maximum(
        jnp.maximum(c2[:, :_FLAT], c2[:, _FLAT:]) + b2_ref[...], 0.0)
    # p2 is the NCHW flatten (TB, 128)

    # fc1 -> relu -> bn1 (eval affine); dropout = identity (eval).
    h1 = jnp.maximum(
        jnp.dot(p2.astype(bf16), fc1w_ref[...], preferred_element_type=f32)
        + fc1b_ref[...], 0.0)
    h1 = h1 * bn1s_ref[...] + bn1t_ref[...]

    # fc2 -> relu -> bn2 (eval affine); dropout = identity (eval).
    h2 = jnp.maximum(
        jnp.dot(h1.astype(bf16), fc2w_ref[...], preferred_element_type=f32)
        + fc2b_ref[...], 0.0)
    h2 = h2 * bn2s_ref[...] + bn2t_ref[...]

    # fc3 -> relu (matches the PyTorch spec); dropout = identity (eval).
    logits = jnp.maximum(
        jnp.dot(h2.astype(bf16), fc3w_ref[...], preferred_element_type=f32)
        + fc3b_ref[...], 0.0)                                   # (TB, 2) f32

    # 2-class softmax via column-slice arithmetic (no cross-lane reductions);
    # EUP approximate reciprocal + one Newton step keeps f32 accuracy.
    l0 = logits[:, 0:1]
    l1 = logits[:, 1:2]
    m = jnp.maximum(l0, l1)
    e0 = jnp.exp(l0 - m)
    e1 = jnp.exp(l1 - m)
    s = e0 + e1
    r = pl.reciprocal(s, approx=True)
    r = r * (2.0 - s * r)

    # Single lane-dense output slab: lanes 0-1 = logits, lanes 2-3 = probs.
    out_ref[...] = jnp.zeros_like(out_ref)
    out_ref[:, 0:2] = logits
    out_ref[:, 2:3] = e0 * r
    out_ref[:, 3:4] = e1 * r


def _round_up(v, m):
    return (v + m - 1) // m * m


def _batch_tile(n):
    # 1024 rows keep the whole step (~25 MB worst case of f32 intermediates +
    # resident bf16 weights) well inside every generation's VMEM, including
    # v7x's 64 MiB/TC; amortizes the ~0.35 us per-grid-step overhead.
    cap = 1024
    tb = min(_round_up(n, 8), cap)
    if n > 8:
        # keep >= 2 grid steps so "parallel" batch tiles feed both v7x TCs.
        tb = min(tb, _round_up((n + 1) // 2, 8))
    return max(tb, 8)


def fused_forward(x_flat, kp):
    """x_flat: (N, 20*seq_len) bf16 (NCHW-flattened). Returns logits/preds/probs."""
    n, in_flat = x_flat.shape
    tb = _batch_tile(n)
    n_pad = _round_up(n, tb)
    if n_pad != n:
        x_flat = jnp.pad(x_flat, ((0, n_pad - n), (0, 0)))

    def row_map(b):
        return (b, 0)

    def const_map(b):
        return (0, 0)

    in_specs = [pl.BlockSpec((tb, in_flat), row_map)]
    # Weights/biases: constant index_map -> stay VMEM-resident across grid
    # steps (no re-DMA).  Their double-buffer overhead is only ~1.4 MB in bf16,
    # so pl.Buffered(1) is intentionally not used.
    in_specs += [pl.BlockSpec(kp[k].shape, const_map) for k in _KP_ORDER]

    out = pl.pallas_call(
        _fused_forward_kernel,
        grid=(n_pad // tb,),
        in_specs=in_specs,
        out_specs=pl.BlockSpec((tb, _OUT_LANES), row_map),
        out_shape=jax.ShapeDtypeStruct((n_pad, _OUT_LANES), jnp.float32),
        compiler_params=pltpu.CompilerParams(
            dimension_semantics=("parallel",),      # batch tiles -> both TCs on v7x
            vmem_limit_bytes=48 * 1024 * 1024),     # raise v5e/v6e scoped default
    )(x_flat, *[kp[k] for k in _KP_ORDER])

    out = out[:n]
    logits = out[:, 0:_NCLS]
    probs = out[:, _NCLS:2 * _NCLS]
    preds = jnp.argmax(logits, axis=1).astype(jnp.int32)   # 2-class argmax in wrapper
    return logits, preds, probs


@jax.jit
def forward(x, kp):
    """x: (N, 1, 20, seq_len) NCHW float; kp: folded kernel params."""
    n = x.shape[0]
    x_flat = x.reshape(n, -1).astype(jnp.bfloat16)   # (N, 20*L), bf16 MXU operand
    return fused_forward(x_flat, kp)


# ----------------------------------------------------------------------------
# One-time parameter preparation (plain JAX, outside the hot path)
# ----------------------------------------------------------------------------
def _expand_conv(conv_w, in_chw, w_offset, ow_keep):
    """Dense matmul form of a VALID conv: returns W_exp of shape
    (Cin*H*W, Cout*OH*ow_keep), columns ordered (cout, oh, ow), where
    (x_flat @ W_exp)[:, (c,i,j)] == conv2d(x, conv_w)[:, c, i, j + w_offset]."""
    c_out, c_in, kh, kw = conv_w.shape
    c_in2, h, w = in_chw
    assert c_in2 == c_in
    oh = h - kh + 1
    canvas = jnp.zeros((c_out, oh, ow_keep, c_in, h, w), jnp.float32)
    cw = conv_w.astype(jnp.float32)
    for i in range(oh):
        for j in range(ow_keep):
            w0 = j + w_offset
            canvas = canvas.at[:, i, j, :, i:i + kh, w0:w0 + kw].set(cw)
    return canvas.reshape(c_out * oh * ow_keep, c_in * h * w).T


def bn_eval_affine(gamma, beta, run_mean, run_var, eps=1e-5):
    scale = gamma / jnp.sqrt(run_var + eps)
    shift = beta - run_mean * scale
    return scale, shift


def fold_params(p, seq_len):
    """Fold convs into lane-aligned bf16 matmul weights (padded + concatenated
    A||B column-shifted pair folds the (1,2) max-pool) and BatchNorm(eval)
    into per-feature f32 affines."""
    f32, bf16 = jnp.float32, jnp.bfloat16
    row = lambda v: v.reshape(1, -1).astype(f32)
    in1 = (1, _AA, seq_len)
    in2 = (_C1, _OH1, _PW1)
    pad = _CONV1_PAD - _CONV1_COLS                                 # 64

    # conv1: two shifted expanded weights, padded 704->768 cols, concatenated.
    w1a = jnp.pad(_expand_conv(p["conv1_w"], in1, 0, _PW1), ((0, 0), (0, pad)))
    w1b = jnp.pad(_expand_conv(p["conv1_w"], in1, 1, _PW1), ((0, 0), (0, pad)))
    w1 = jnp.concatenate([w1a, w1b], axis=1).astype(bf16)          # (20L, 1536)
    b1 = jnp.pad(jnp.repeat(p["conv1_b"].astype(f32), _OH1 * _PW1), (0, pad))

    # conv2: rows padded 704->768 to match the padded conv1 layout.
    w2a = jnp.pad(_expand_conv(p["conv2_w"], in2, 0, _PW2), ((0, pad), (0, 0)))
    w2b = jnp.pad(_expand_conv(p["conv2_w"], in2, 1, _PW2), ((0, pad), (0, 0)))
    w2 = jnp.concatenate([w2a, w2b], axis=1).astype(bf16)          # (768, 256)
    b2 = jnp.repeat(p["conv2_b"].astype(f32), _OH2 * _PW2)         # (128,)

    s1, t1 = bn_eval_affine(p["bn1_g"], p["bn1_b"], p["bn1_m"], p["bn1_v"])
    s2, t2 = bn_eval_affine(p["bn2_g"], p["bn2_b"], p["bn2_m"], p["bn2_v"])
    return {
        "w1": w1, "b1": b1.reshape(1, -1),
        "w2": w2, "b2": b2.reshape(1, -1),
        "fc1_w": p["fc1_w"].astype(bf16), "fc1_b": row(p["fc1_b"]),
        "bn1_s": row(s1), "bn1_t": row(t1),
        "fc2_w": p["fc2_w"].astype(bf16), "fc2_b": row(p["fc2_b"]),
        "bn2_s": row(s2), "bn2_t": row(t2),
        "fc3_w": p["fc3_w"].astype(bf16), "fc3_b": row(p["fc3_b"]),
    }


def init_params(key, seq_len):
    kw1 = seq_len - 8
    ks = jax.random.split(key, 18)

    def nrm(k, shape, s=0.1):
        return s * jax.random.normal(k, shape, jnp.float32)

    return {
        "conv1_w": nrm(ks[0], (_C1, 1, _KH1, kw1)),
        "conv1_b": nrm(ks[1], (_C1,)),
        "conv2_w": nrm(ks[2], (_C2, _C1, _KH2, _KW2)),
        "conv2_b": nrm(ks[3], (_C2,)),
        "fc1_w": nrm(ks[4], (_FLAT, _FC1)),     # stored (in, out) = torch weight.T
        "fc1_b": nrm(ks[5], (_FC1,)),
        "fc2_w": nrm(ks[6], (_FC1, _FC2)),
        "fc2_b": nrm(ks[7], (_FC2,)),
        "fc3_w": nrm(ks[8], (_FC2, _NCLS)),
        "fc3_b": nrm(ks[9], (_NCLS,)),
        # BatchNorm1d (eval mode): weight/bias + running stats.
        "bn1_g": 1.0 + nrm(ks[10], (_FC1,)),
        "bn1_b": nrm(ks[11], (_FC1,)),
        "bn1_m": nrm(ks[12], (_FC1,), 0.05),
        "bn1_v": 0.5 + jnp.abs(nrm(ks[13], (_FC1,), 0.5)),
        "bn2_g": 1.0 + nrm(ks[14], (_FC2,)),
        "bn2_b": nrm(ks[15], (_FC2,)),
        "bn2_m": nrm(ks[16], (_FC2,), 0.05),
        "bn2_v": 0.5 + jnp.abs(nrm(ks[17], (_FC2,), 0.5)),
    }


# ----------------------------------------------------------------------------
# Plain-JAX reference with the same bf16-operand / f32-accumulate contract
# (so the folding/fusion logic can be checked tightly).
# ----------------------------------------------------------------------------
def reference_forward(x, p, operand_dtype=jnp.float32):
    od, f32 = operand_dtype, jnp.float32
    dn1 = jax.lax.conv_dimension_numbers(x.shape, p["conv1_w"].shape,
                                         ("NCHW", "OIHW", "NCHW"))
    c1 = jax.lax.conv_general_dilated(x.astype(od), p["conv1_w"].astype(od),
                                      (1, 1), "VALID", dimension_numbers=dn1,
                                      preferred_element_type=f32)
    c1 = jax.nn.relu(c1 + p["conv1_b"][None, :, None, None])
    c1 = jnp.maximum(c1[..., :-1], c1[..., 1:])
    dn2 = jax.lax.conv_dimension_numbers(c1.shape, p["conv2_w"].shape,
                                         ("NCHW", "OIHW", "NCHW"))
    c2 = jax.lax.conv_general_dilated(c1.astype(od), p["conv2_w"].astype(od),
                                      (1, 1), "VALID", dimension_numbers=dn2,
                                      preferred_element_type=f32)
    c2 = jax.nn.relu(c2 + p["conv2_b"][None, :, None, None])
    c2 = jnp.maximum(c2[..., :-1], c2[..., 1:])
    flat = c2.reshape(x.shape[0], -1)
    s1, t1 = bn_eval_affine(p["bn1_g"], p["bn1_b"], p["bn1_m"], p["bn1_v"])
    s2, t2 = bn_eval_affine(p["bn2_g"], p["bn2_b"], p["bn2_m"], p["bn2_v"])
    h1 = jax.nn.relu(jnp.dot(flat.astype(od), p["fc1_w"].astype(od),
                             preferred_element_type=f32) + p["fc1_b"]) * s1 + t1
    h2 = jax.nn.relu(jnp.dot(h1.astype(od), p["fc2_w"].astype(od),
                             preferred_element_type=f32) + p["fc2_b"]) * s2 + t2
    logits = jax.nn.relu(jnp.dot(h2.astype(od), p["fc3_w"].astype(od),
                                 preferred_element_type=f32) + p["fc3_b"])
    return logits, jax.nn.softmax(logits, axis=1)


if __name__ == "__main__":
    seq_len = 16                     # valid CDR3 length (12..16)
    key = jax.random.PRNGKey(0)
    kx1, kx2, kparam = jax.random.split(key, 3)

    raw = init_params(kparam, seq_len)
    kp = fold_params(raw, seq_len)   # one-time folding (convs -> matmuls, BN -> affine)

    # batch=2 (single grid step) and batch=24 (2 grid steps + batch padding).
    for batch, kx in ((2, kx1), (24, kx2)):
        x = jax.random.normal(kx, (batch, 1, _AA, seq_len), jnp.float32)
        logits, preds, probs = forward(x, kp)
        jax.block_until_ready((logits, preds, probs))

        assert logits.shape == (batch, _NCLS)
        assert preds.shape == (batch,)
        assert probs.shape == (batch, _NCLS)
        assert bool(jnp.all(jnp.isfinite(logits)))
        assert bool(jnp.all(jnp.abs(jnp.sum(probs, axis=1) - 1.0) < 1e-4))
        assert bool(jnp.all((preds == 0) | (preds == 1)))

        # Tight check against a reference that uses the same bf16-operand /
        # f32-accumulate contract (only MXU accumulation-order noise remains).
        ref_logits, ref_probs = reference_forward(x, raw, operand_dtype=jnp.bfloat16)
        assert bool(jnp.max(jnp.abs(logits - ref_logits)) < 1e-2)
        assert bool(jnp.max(jnp.abs(probs - ref_probs)) < 1e-2)

    print("KERNEL_OK")
</pallas_src>

<mosaic_0001>
module attributes {stable_mosaic.version = 11 : i64} {
  func.func @_fused_forward_kernel(%arg0: i32, %arg1: memref<8x320xbf16, #tpu.memory_space<vmem>>, %arg2: memref<320x1536xbf16, #tpu.memory_space<vmem>>, %arg3: memref<1x768xf32, #tpu.memory_space<vmem>>, %arg4: memref<768x256xbf16, #tpu.memory_space<vmem>>, %arg5: memref<1x128xf32, #tpu.memory_space<vmem>>, %arg6: memref<128x50xbf16, #tpu.memory_space<vmem>>, %arg7: memref<1x50xf32, #tpu.memory_space<vmem>>, %arg8: memref<1x50xf32, #tpu.memory_space<vmem>>, %arg9: memref<1x50xf32, #tpu.memory_space<vmem>>, %arg10: memref<50x10xbf16, #tpu.memory_space<vmem>>, %arg11: memref<1x10xf32, #tpu.memory_space<vmem>>, %arg12: memref<1x10xf32, #tpu.memory_space<vmem>>, %arg13: memref<1x10xf32, #tpu.memory_space<vmem>>, %arg14: memref<10x2xbf16, #tpu.memory_space<vmem>>, %arg15: memref<1x2xf32, #tpu.memory_space<vmem>>, %arg16: memref<8x128xf32, #tpu.memory_space<vmem>>) attributes {dimension_semantics = [#tpu.dimension_semantics<parallel>], iteration_bounds = array<i64: 1>, scalar_prefetch = 0 : i64, scratch_operands = 0 : i64, tpu.core_type = #tpu.core_type<tc>, window_params = [{transform_indices = @transform_0, window_bounds = array<i64: 8, 320>}, {pipeline_mode = #tpu.pipeline_mode<synchronous>, transform_indices = @transform_1, window_bounds = array<i64: 320, 1536>}, {pipeline_mode = #tpu.pipeline_mode<synchronous>, transform_indices = @transform_2, window_bounds = array<i64: 1, 768>}, {pipeline_mode = #tpu.pipeline_mode<synchronous>, transform_indices = @transform_3, window_bounds = array<i64: 768, 256>}, {pipeline_mode = #tpu.pipeline_mode<synchronous>, transform_indices = @transform_4, window_bounds = array<i64: 1, 128>}, {pipeline_mode = #tpu.pipeline_mode<synchronous>, transform_indices = @transform_5, window_bounds = array<i64: 128, 50>}, {pipeline_mode = #tpu.pipeline_mode<synchronous>, transform_indices = @transform_6, window_bounds = array<i64: 1, 50>}, {pipeline_mode = #tpu.pipeline_mode<synchronous>, transform_indices = @transform_7, window_bounds = array<i64: 1, 50>}, {pipeline_mode = #tpu.pipeline_mode<synchronous>, transform_indices = @transform_8, window_bounds = array<i64: 1, 50>}, {pipeline_mode = #tpu.pipeline_mode<synchronous>, transform_indices = @transform_9, window_bounds = array<i64: 50, 10>}, {pipeline_mode = #tpu.pipeline_mode<synchronous>, transform_indices = @transform_10, window_bounds = array<i64: 1, 10>}, {pipeline_mode = #tpu.pipeline_mode<synchronous>, transform_indices = @transform_11, window_bounds = array<i64: 1, 10>}, {pipeline_mode = #tpu.pipeline_mode<synchronous>, transform_indices = @transform_12, window_bounds = array<i64: 1, 10>}, {pipeline_mode = #tpu.pipeline_mode<synchronous>, transform_indices = @transform_13, window_bounds = array<i64: 10, 2>}, {pipeline_mode = #tpu.pipeline_mode<synchronous>, transform_indices = @transform_14, window_bounds = array<i64: 1, 2>}, {transform_indices = @transform_15, window_bounds = array<i64: 8, 128>}]} {
    %c0 = arith.constant 0 : index
    %c0_0 = arith.constant 0 : index
    %0 = vector.load %arg1[%c0, %c0_0] : memref<8x320xbf16, #tpu.memory_space<vmem>>, vector<8x320xbf16>
    %c0_1 = arith.constant 0 : index
    %c0_2 = arith.constant 0 : index
    %1 = vector.load %arg2[%c0_1, %c0_2] : memref<320x1536xbf16, #tpu.memory_space<vmem>>, vector<320x1536xbf16>
    %cst = arith.constant dense<0.000000e+00> : vector<8x1536xf32>
    %2 = tpu.matmul %0, %1, %cst {dimension_numbers = #tpu.dot_dimension_numbers<[1], [0], [0], [1], [0, 0, 1, 1], [], []>} : vector<8x320xbf16>, vector<320x1536xbf16>, vector<8x1536xf32> -> vector<8x1536xf32>
    %3 = vector.extract_strided_slice %2 {offsets = [0, 0], sizes = [8, 768], strides = [1, 1]} : vector<8x1536xf32> to vector<8x768xf32>
    %4 = vector.extract_strided_slice %2 {offsets = [0, 768], sizes = [8, 768], strides = [1, 1]} : vector<8x1536xf32> to vector<8x768xf32>
    %5 = arith.maximumf %3, %4 : vector<8x768xf32>
    %c0_3 = arith.constant 0 : index
    %c0_4 = arith.constant 0 : index
    %6 = vector.load %arg3[%c0_3, %c0_4] : memref<1x768xf32, #tpu.memory_space<vmem>>, vector<1x768xf32>
    %7 = vector.broadcast %6 : vector<1x768xf32> to vector<8x768xf32>
    %8 = arith.addf %5, %7 : vector<8x768xf32>
    %cst_5 = arith.constant 0.000000e+00 : f32
    %9 = vector.broadcast %cst_5 : f32 to vector<8x768xf32>
    %10 = arith.maximumf %8, %9 : vector<8x768xf32>
    %11 = arith.truncf %10 : vector<8x768xf32> to vector<8x768xbf16>
    %c0_6 = arith.constant 0 : index
    %c0_7 = arith.constant 0 : index
    %12 = vector.load %arg4[%c0_6, %c0_7] : memref<768x256xbf16, #tpu.memory_space<vmem>>, vector<768x256xbf16>
    %cst_8 = arith.constant dense<0.000000e+00> : vector<8x256xf32>
    %13 = tpu.matmul %11, %12, %cst_8 {dimension_numbers = #tpu.dot_dimension_numbers<[1], [0], [0], [1], [0, 0, 1, 1], [], []>} : vector<8x768xbf16>, vector<768x256xbf16>, vector<8x256xf32> -> vector<8x256xf32>
    %14 = vector.extract_strided_slice %13 {offsets = [0, 0], sizes = [8, 128], strides = [1, 1]} : vector<8x256xf32> to vector<8x128xf32>
    %15 = vector.extract_strided_slice %13 {offsets = [0, 128], sizes = [8, 128], strides = [1, 1]} : vector<8x256xf32> to vector<8x128xf32>
    %16 = arith.maximumf %14, %15 : vector<8x128xf32>
    %c0_9 = arith.constant 0 : index
    %c0_10 = arith.constant 0 : index
    %17 = vector.load %arg5[%c0_9, %c0_10] : memref<1x128xf32, #tpu.memory_space<vmem>>, vector<1x128xf32>
    %18 = vector.broadcast %17 : vector<1x128xf32> to vector<8x128xf32>
    %19 = arith.addf %16, %18 : vector<8x128xf32>
    %cst_11 = arith.constant 0.000000e+00 : f32
    %20 = vector.broadcast %cst_11 : f32 to vector<8x128xf32>
    %21 = arith.maximumf %19, %20 : vector<8x128xf32>
    %22 = arith.truncf %21 : vector<8x128xf32> to vector<8x128xbf16>
    %c0_12 = arith.constant 0 : index
    %c0_13 = arith.constant 0 : index
    %23 = vector.load %arg6[%c0_12, %c0_13] : memref<128x50xbf16, #tpu.memory_space<vmem>>, vector<128x50xbf16>
    %cst_14 = arith.constant dense<0.000000e+00> : vector<8x50xf32>
    %24 = tpu.matmul %22, %23, %cst_14 {dimension_numbers = #tpu.dot_dimension_numbers<[1], [0], [0], [1], [0, 0, 1, 1], [], []>} : vector<8x128xbf16>, vector<128x50xbf16>, vector<8x50xf32> -> vector<8x50xf32>
    %c0_15 = arith.constant 0 : index
    %c0_16 = arith.constant 0 : index
    %25 = vector.load %arg7[%c0_15, %c0_16] : memref<1x50xf32, #tpu.memory_space<vmem>>, vector<1x50xf32>
    %26 = vector.broadcast %25 : vector<1x50xf32> to vector<8x50xf32>
    %27 = arith.addf %24, %26 : vector<8x50xf32>
    %cst_17 = arith.constant 0.000000e+00 : f32
    %28 = vector.broadcast %cst_17 : f32 to vector<8x50xf32>
    %29 = arith.maximumf %27, %28 : vector<8x50xf32>
    %c0_18 = arith.constant 0 : index
    %c0_19 = arith.constant 0 : index
    %30 = vector.load %arg8[%c0_18, %c0_19] : memref<1x50xf32, #tpu.memory_space<vmem>>, vector<1x50xf32>
    %31 = vector.broadcast %30 : vector<1x50xf32> to vector<8x50xf32>
    %32 = arith.mulf %29, %31 : vector<8x50xf32>
    %c0_20 = arith.constant 0 : index
    %c0_21 = arith.constant 0 : index
    %33 = vector.load %arg9[%c0_20, %c0_21] : memref<1x50xf32, #tpu.memory_space<vmem>>, vector<1x50xf32>
    %34 = vector.broadcast %33 : vector<1x50xf32> to vector<8x50xf32>
    %35 = arith.addf %32, %34 : vector<8x50xf32>
    %36 = arith.truncf %35 : vector<8x50xf32> to vector<8x50xbf16>
    %c0_22 = arith.constant 0 : index
    %c0_23 = arith.constant 0 : index
    %37 = vector.load %arg10[%c0_22, %c0_23] : memref<50x10xbf16, #tpu.memory_space<vmem>>, vector<50x10xbf16>
    %cst_24 = arith.constant dense<0.000000e+00> : vector<8x10xf32>
    %38 = tpu.matmul %36, %37, %cst_24 {dimension_numbers = #tpu.dot_dimension_numbers<[1], [0], [0], [1], [0, 0, 1, 1], [], []>} : vector<8x50xbf16>, vector<50x10xbf16>, vector<8x10xf32> -> vector<8x10xf32>
    %c0_25 = arith.constant 0 : index
    %c0_26 = arith.constant 0 : index
    %39 = vector.load %arg11[%c0_25, %c0_26] : memref<1x10xf32, #tpu.memory_space<vmem>>, vector<1x10xf32>
    %40 = vector.broadcast %39 : vector<1x10xf32> to vector<8x10xf32>
    %41 = arith.addf %38, %40 : vector<8x10xf32>
    %cst_27 = arith.constant 0.000000e+00 : f32
    %42 = vector.broadcast %cst_27 : f32 to vector<8x10xf32>
    %43 = arith.maximumf %41, %42 : vector<8x10xf32>
    %c0_28 = arith.constant 0 : index
    %c0_29 = arith.constant 0 : index
    %44 = vector.load %arg12[%c0_28, %c0_29] : memref<1x10xf32, #tpu.memory_space<vmem>>, vector<1x10xf32>
    %45 = vector.broadcast %44 : vector<1x10xf32> to vector<8x10xf32>
    %46 = arith.mulf %43, %45 : vector<8x10xf32>
    %c0_30 = arith.constant 0 : index
    %c0_31 = arith.constant 0 : index
    %47 = vector.load %arg13[%c0_30, %c0_31] : memref<1x10xf32, #tpu.memory_space<vmem>>, vector<1x10xf32>
    %48 = vector.broadcast %47 : vector<1x10xf32> to vector<8x10xf32>
    %49 = arith.addf %46, %48 : vector<8x10xf32>
    %50 = arith.truncf %49 : vector<8x10xf32> to vector<8x10xbf16>
    %c0_32 = arith.constant 0 : index
    %c0_33 = arith.constant 0 : index
    %51 = vector.load %arg14[%c0_32, %c0_33] : memref<10x2xbf16, #tpu.memory_space<vmem>>, vector<10x2xbf16>
    %cst_34 = arith.constant dense<0.000000e+00> : vector<8x2xf32>
    %52 = tpu.matmul %50, %51, %cst_34 {dimension_numbers = #tpu.dot_dimension_numbers<[1], [0], [0], [1], [0, 0, 1, 1], [], []>} : vector<8x10xbf16>, vector<10x2xbf16>, vector<8x2xf32> -> vector<8x2xf32>
    %c0_35 = arith.constant 0 : index
    %c0_36 = arith.constant 0 : index
    %53 = vector.load %arg15[%c0_35, %c0_36] : memref<1x2xf32, #tpu.memory_space<vmem>>, vector<1x2xf32>
    %54 = vector.broadcast %53 : vector<1x2xf32> to vector<8x2xf32>
    %55 = arith.addf %52, %54 : vector<8x2xf32>
    %cst_37 = arith.constant 0.000000e+00 : f32
    %56 = vector.broadcast %cst_37 : f32 to vector<8x2xf32>
    %57 = arith.maximumf %55, %56 : vector<8x2xf32>
    %58 = vector.extract_strided_slice %57 {offsets = [0, 0], sizes = [8, 1], strides = [1, 1]} : vector<8x2xf32> to vector<8x1xf32>
    %59 = vector.extract_strided_slice %57 {offsets = [0, 1], sizes = [8, 1], strides = [1, 1]} : vector<8x2xf32> to vector<8x1xf32>
    %60 = arith.maximumf %58, %59 : vector<8x1xf32>
    %61 = arith.subf %58, %60 : vector<8x1xf32>
    %62 = math.exp %61 : vector<8x1xf32>
    %63 = arith.subf %59, %60 : vector<8x1xf32>
    %64 = math.exp %63 : vector<8x1xf32>
    %65 = arith.addf %62, %64 : vector<8x1xf32>
    %66 = tpu.reciprocal %65 {approx = true} : vector<8x1xf32> -> vector<8x1xf32>
    %67 = arith.mulf %65, %66 : vector<8x1xf32>
    %cst_38 = arith.constant 2.000000e+00 : f32
    %68 = vector.broadcast %cst_38 : f32 to vector<8x1xf32>
    %69 = arith.subf %68, %67 : vector<8x1xf32>
    %70 = arith.mulf %66, %69 : vector<8x1xf32>
    %cst_39 = arith.constant 0.000000e+00 : f32
    %71 = vector.broadcast %cst_39 : f32 to vector<8x128xf32>
    %c0_40 = arith.constant 0 : index
    %c0_41 = arith.constant 0 : index
    %72 = vector.load %arg16[%c0_40, %c0_41] : memref<8x128xf32, #tpu.memory_space<vmem>>, vector<8x128xf32>
    tpu.vector_store %arg16[%c0_40, %c0_41], %71 {strides = array<i32>} : memref<8x128xf32, #tpu.memory_space<vmem>>, vector<8x128xf32>,
    %c0_42 = arith.constant 0 : index
    %c0_43 = arith.constant 0 : index
    %73 = vector.load %arg16[%c0_42, %c0_43] : memref<8x128xf32, #tpu.memory_space<vmem>>, vector<8x2xf32>
    tpu.vector_store %arg16[%c0_42, %c0_43], %57 {strides = array<i32>} : memref<8x128xf32, #tpu.memory_space<vmem>>, vector<8x2xf32>,
    %74 = arith.mulf %62, %70 : vector<8x1xf32>
    %c0_44 = arith.constant 0 : index
    %c2 = arith.constant 2 : index
    %75 = vector.load %arg16[%c0_44, %c2] : memref<8x128xf32, #tpu.memory_space<vmem>>, vector<8x1xf32>
    tpu.vector_store %arg16[%c0_44, %c2], %74 {strides = array<i32>} : memref<8x128xf32, #tpu.memory_space<vmem>>, vector<8x1xf32>,
    %76 = arith.mulf %64, %70 : vector<8x1xf32>
    %c0_45 = arith.constant 0 : index
    %c3 = arith.constant 3 : index
    %77 = vector.load %arg16[%c0_45, %c3] : memref<8x128xf32, #tpu.memory_space<vmem>>, vector<8x1xf32>
    tpu.vector_store %arg16[%c0_45, %c3], %76 {strides = array<i32>} : memref<8x128xf32, #tpu.memory_space<vmem>>, vector<8x1xf32>,
    return
  }
  func.func @transform_0(%arg0: i32) -> (i32, i32) {
    %c0_i32 = arith.constant 0 : i32
    %c0_i32_0 = arith.constant 0 : i32
    return %arg0, %c0_i32 : i32, i32
  }
  func.func @transform_1(%arg0: i32) -> (i32, i32) {
    %c0_i32 = arith.constant 0 : i32
    %c0_i32_0 = arith.constant 0 : i32
    %c0_i32_1 = arith.constant 0 : i32
    return %c0_i32, %c0_i32_0 : i32, i32
  }
  func.func @transform_2(%arg0: i32) -> (i32, i32) {
    %c0_i32 = arith.constant 0 : i32
    %c0_i32_0 = arith.constant 0 : i32
    %c0_i32_1 = arith.constant 0 : i32
    return %c0_i32, %c0_i32_0 : i32, i32
  }
  func.func @transform_3(%arg0: i32) -> (i32, i32) {
    %c0_i32 = arith.constant 0 : i32
    %c0_i32_0 = arith.constant 0 : i32
    %c0_i32_1 = arith.constant 0 : i32
    return %c0_i32, %c0_i32_0 : i32, i32
  }
  func.func @transform_4(%arg0: i32) -> (i32, i32) {
    %c0_i32 = arith.constant 0 : i32
    %c0_i32_0 = arith.constant 0 : i32
    %c0_i32_1 = arith.constant 0 : i32
    return %c0_i32, %c0_i32_0 : i32, i32
  }
  func.func @transform_5(%arg0: i32) -> (i32, i32) {
    %c0_i32 = arith.constant 0 : i32
    %c0_i32_0 = arith.constant 0 : i32
    %c0_i32_1 = arith.constant 0 : i32
    return %c0_i32, %c0_i32_0 : i32, i32
  }
  func.func @transform_6(%arg0: i32) -> (i32, i32) {
    %c0_i32 = arith.constant 0 : i32
    %c0_i32_0 = arith.constant 0 : i32
    %c0_i32_1 = arith.constant 0 : i32
    return %c0_i32, %c0_i32_0 : i32, i32
  }
  func.func @transform_7(%arg0: i32) -> (i32, i32) {
    %c0_i32 = arith.constant 0 : i32
    %c0_i32_0 = arith.constant 0 : i32
    %c0_i32_1 = arith.constant 0 : i32
    return %c0_i32, %c0_i32_0 : i32, i32
  }
  func.func @transform_8(%arg0: i32) -> (i32, i32) {
    %c0_i32 = arith.constant 0 : i32
    %c0_i32_0 = arith.constant 0 : i32
    %c0_i32_1 = arith.constant 0 : i32
    return %c0_i32, %c0_i32_0 : i32, i32
  }
  func.func @transform_9(%arg0: i32) -> (i32, i32) {
    %c0_i32 = arith.constant 0 : i32
    %c0_i32_0 = arith.constant 0 : i32
    %c0_i32_1 = arith.constant 0 : i32
    return %c0_i32, %c0_i32_0 : i32, i32
  }
  func.func @transform_10(%arg0: i32) -> (i32, i32) {
    %c0_i32 = arith.constant 0 : i32
    %c0_i32_0 = arith.constant 0 : i32
    %c0_i32_1 = arith.constant 0 : i32
    return %c0_i32, %c0_i32_0 : i32, i32
  }
  func.func @transform_11(%arg0: i32) -> (i32, i32) {
    %c0_i32 = arith.constant 0 : i32
    %c0_i32_0 = arith.constant 0 : i32
    %c0_i32_1 = arith.constant 0 : i32
    return %c0_i32, %c0_i32_0 : i32, i32
  }
  func.func @transform_12(%arg0: i32) -> (i32, i32) {
    %c0_i32 = arith.constant 0 : i32
    %c0_i32_0 = arith.constant 0 : i32
    %c0_i32_1 = arith.constant 0 : i32
    return %c0_i32, %c0_i32_0 : i32, i32
  }
  func.func @transform_13(%arg0: i32) -> (i32, i32) {
    %c0_i32 = arith.constant 0 : i32
    %c0_i32_0 = arith.constant 0 : i32
    %c0_i32_1 = arith.constant 0 : i32
    return %c0_i32, %c0_i32_0 : i32, i32
  }
  func.func @transform_14(%arg0: i32) -> (i32, i32) {
    %c0_i32 = arith.constant 0 : i32
    %c0_i32_0 = arith.constant 0 : i32
    %c0_i32_1 = arith.constant 0 : i32
    return %c0_i32, %c0_i32_0 : i32, i32
  }
  func.func @transform_15(%arg0: i32) -> (i32, i32) {
    %c0_i32 = arith.constant 0 : i32
    %c0_i32_0 = arith.constant 0 : i32
    return %arg0, %c0_i32 : i32, i32
  }
}

</mosaic_0001>

<bundles_post_ra>
// kernel: forward.1
= control target key start
LH: loop header
LB: loop body
LE: loop exit
PB: predicated region body
PF: predicated region fallthrough
CT: control target
= control target key end

     0   :  { %20 = vsyncpa [#allocation3], 0  ;;  %s4483_s0 = inlined_call_operand.vmem [shape: bf16[8,320], index: 0, kind: input, shape index: {}]   ;;  %s4484_s1 = inlined_call_operand.hbm [shape: bf16[320,1536], index: 1, kind: input, shape index: {}]   ;;  %s4485_s2 = inlined_call_operand.vmem [shape: f32[1,768], index: 2, kind: input, shape index: {}]   ;;  %s4486_s3 = inlined_call_operand.hbm [shape: bf16[768,256], index: 3, kind: input, shape index: {}]   ;;  %s4487_s4 = inlined_call_operand.vmem [shape: f32[1,128], index: 4, kind: input, shape index: {}]   ;;  %s4488_s5 = inlined_call_operand.vmem [shape: bf16[128,50], index: 5, kind: input, shape index: {}]   ;;  %s4489_s6 = inlined_call_operand.vmem [shape: f32[1,50], index: 6, kind: input, shape index: {}]   ;;  %s4490_s7 = inlined_call_operand.vmem [shape: f32[1,50], index: 7, kind: input, shape index: {}]   ;;  %s4491_s8 = inlined_call_operand.vmem [shape: f32[1,50], index: 8, kind: input, shape index: {}]   ;;  %s4492_s9 = inlined_call_operand.vmem [shape: bf16[50,10], index: 9, kind: input, shape index: {}]   ;;  %s4493_s10 = inlined_call_operand.vmem [shape: f32[1,10], index: 10, kind: input, shape index: {}]   ;;  %s4494_s11 = inlined_call_operand.vmem [shape: f32[1,10], index: 11, kind: input, shape index: {}]   ;;  %s4495_s12 = inlined_call_operand.vmem [shape: f32[1,10], index: 12, kind: input, shape index: {}]   ;;  %s4496_s13 = inlined_call_operand.vmem [shape: bf16[10,2], index: 13, kind: input, shape index: {}]   ;;  %s4497_s14 = inlined_call_operand.vmem [shape: f32[1,2], index: 14, kind: input, shape index: {}]   ;;  %s4498_s15 = inlined_call_operand.vmem [shape: f32[8,128], index: 15, kind: output, shape index: {}]  }
   0x1   :  { %21 = vsyncpa [#allocation5], 0  ;;  %s4176_s18 = smov [#allocation2]   ;;  %s4128_s22 = scalar_lea.hbm %s4484_s1, 30720 }
   0x2   :  { %s29_s19 = sshll.u32 %s4176_s18, 4  ;;  %p4129_p0 = scmp.ne.s32.totalorder %s4484_s1, %s4128_s22  ;;  %s30_s19 = int_to_ptr.vmem [resolvable:$true] %s29_s19 }
   0x3   :  { %p4132_p1 = scmp.lt.u32.totalorder %s4128_s22, %s4484_s1 }
   0x5   :  { %p4134_p2 = pnand %p4132_p1, %p4129_p0 }
   0x7   :  { %4137 = shalt.err (!%p4134_p2)
}
   0x8   :  { %s4138_s27 = scalar_lea.vmem %s30_s19, 30720  ;;  %p4143_p4 = scmp.lt.s32.totalorder %s30_s19, %s30_s19 }
   0x9   :  { %p4139_p3 = scmp.ne.s32.totalorder %s30_s19, %s4138_s27  ;;  %p4144_p5 = scmp.lt.s32.totalorder %s4138_s27, %s4138_s27 }
   0xb   :  { %p4145_p6 = por %p4144_p5, %p4143_p4 }
   0xd   :  { %p4146_p7 = pnand %p4145_p6, %p4139_p3 }
   0xf   :  { %4149 = shalt.err (!%p4146_p7)
}
  0x10   :  { %s4177_s28 = smov 768   ;;  %s4178_s29 = smov 48  }
  0x11   :  { %35 = dma.hbm_to_vmem [thread:$0]  %s4484_s1, 30720, %s30_s19, [#allocation3], %s4177_s28, %s4177_s28, %s4178_s29  }
  0x12   :  { %s4179_s17 = smov [#allocation4]   ;;  %s4150_s22 = scalar_lea.hbm %s4486_s3, 12288 }
  0x13   :  { %s43_s18 = sshll.u32 %s4179_s17, 4  ;;  %p4151_p8 = scmp.ne.s32.totalorder %s4486_s3, %s4150_s22  ;;  %s44_s18 = int_to_ptr.vmem [resolvable:$true] %s43_s18 }
  0x14   :  { %p4154_p9 = scmp.lt.u32.totalorder %s4150_s22, %s4486_s3 }
  0x16   :  { %p4156_p10 = pnand %p4154_p9, %p4151_p8 }
  0x18   :  { %4159 = shalt.err (!%p4156_p10)
}
  0x19   :  { %s4160_s27 = scalar_lea.vmem %s44_s18, 12288  ;;  %p4165_p12 = scmp.lt.s32.totalorder %s44_s18, %s44_s18 }
  0x1a   :  { %p4161_p11 = scmp.ne.s32.totalorder %s44_s18, %s4160_s27  ;;  %p4166_p13 = scmp.lt.s32.totalorder %s4160_s27, %s4160_s27 }
  0x1c   :  { %p4167_p0 = por %p4166_p13, %p4165_p12 }
  0x1e   :  { %p4168_p1 = pnand %p4167_p0, %p4161_p11 }
  0x20   :  { %4171 = shalt.err (!%p4168_p1)
}
  0x21   :  { %s4180_s1 = smov 128   ;;  %s4181_s19 = smov 8  }
  0x22   :  { %49 = dma.hbm_to_vmem [thread:$0]  %s4486_s3, 12288, %s44_s18, [#allocation5], %s4180_s1, %s4180_s1, %s4181_s19  }
  0x23   :  { %4172 = dma.done.wait [#allocation3], 30720  }
  0x24   :  { %4173 = vsyncadd [#allocation3], 4294936576 }
  0x25   :  { %4174 = dma.done.wait [#allocation5], 12288  }
  0x26   :  { %4175 = vsyncadd [#allocation5], 4294955008  ;;  %v4182_v0 = vmov 0   ;;  %v3601_v1 = vld [vmem:[#allocation2 + $0x4] ss:$48 sps:$4 sm:$0xff]   ;;  %vm1531_vm0 = vcmask 523264  }
  0x27   :  { %1608 = vmatprep.mubr.bf16.mxu0 %v4182_v0  ;;  %v3603_v2 = vld [vmem:[#allocation2 + $0x604] ss:$48 sps:$4 sm:$0xff]   ;;  %1535 = vmatprep.subr.bf16.mxu1 %v3601_v1  ;;  %v3605_v3 = vld [vmem:[#allocation2] ss:$48 sps:$4 sm:$0xff]   ;;  %v4296_v20 = vld [vmem:[%s4483_s0 + $0x8] ss:$0 sps:$4 sm:$0xff]  }
  0x28   :  { %v3606_v4 = vld [vmem:[#allocation2 + $0x600] ss:$48 sps:$4 sm:$0xff]   ;;  %1576 = vmatprep.subr.bf16.mxu0 %v3603_v2  ;;  %v3607_v5 = vld [vmem:[#allocation2 + $0x64] ss:$48 sps:$4 sm:$0xff]   ;;  %1536 = vmatpush1.bf16.msra.mxu1 %v3605_v3  ;;  %vm4184_vm1 = vmmov 0   ;;  %vm2961_vm2 = vcmask 1040384  }
  0x29   :  { %1577 = vmatpush1.bf16.msra.mxu0 %v3606_v4  ;;  %v3609_v6 = vld [vmem:[#allocation2 + $0x664] ss:$48 sps:$4 sm:$0xff]   ;;  %v3611_v7 = vld [vmem:[#allocation2 + $0x60] ss:$48 sps:$4 sm:$0xff]   ;;  %1537 = vmatprep.subr.bf16.mxu1 %v3607_v5  ;;  %v3702_v5 = vld [vmem:[#allocation2 + $0xc] ss:$48 sps:$4 sm:$0xff]  }
  0x2a   :  { %v3612_v8 = vld [vmem:[#allocation2 + $0x660] ss:$48 sps:$4 sm:$0xff]   ;;  %1578 = vmatprep.subr.bf16.mxu0 %v3609_v6  ;;  %v3613_v9 = vld [vmem:[#allocation2 + $0xc4] ss:$48 sps:$4 sm:$0xff]   ;;  %vm2957_vm3 = vcmask 408576   ;;  %vm3041_vm4 = vcmask 1044480  }
  0x2b   :  { %v3615_v10 = vld [vmem:[#allocation2 + $0x6c4] ss:$48 sps:$4 sm:$0xff]   ;;  %v3617_v11 = vld [vmem:[#allocation2 + $0xc0] ss:$48 sps:$4 sm:$0xff]   ;;  %vm3037_vm5 = vcmask 80896   ;;  %vm3111_vm6 = vcmask 15360  }
  0x2c   :  { %v3618_v12 = vld [vmem:[#allocation2 + $0x6c0] ss:$48 sps:$4 sm:$0xff]   ;;  %1538 = vmatpush1.bf16.msra.mxu1 %v3611_v7  ;;  %v3619_v13 = vld [vmem:[#allocation2 + $0x124] ss:$48 sps:$4 sm:$0xff]   ;;  %s4186_s21 = smov 1   ;;  %vm3118_vm7 = vcmask 23568  }
  0x2d   :  { %1579 = vmatpush1.bf16.msra.mxu0 %v3612_v8  ;;  %1539 = vmatprep.subr.bf16.mxu1 %v3613_v9  ;;  %v3621_v14 = vld [vmem:[#allocation2 + $0x724] ss:$48 sps:$4 sm:$0xff]   ;;  %v3623_v15 = vld [vmem:[#allocation2 + $0x120] ss:$48 sps:$4 sm:$0xff]   ;;  %v3700_v8 = vld [vmem:[#allocation2 + $0x8] ss:$48 sps:$4 sm:$0xff]  }
  0x2e   :  { %1580 = vmatprep.subr.bf16.mxu0 %v3615_v10  ;;  %v3624_v16 = vld [vmem:[#allocation2 + $0x720] ss:$48 sps:$4 sm:$0xff]   ;;  %v3625_v17 = vld [vmem:[#allocation2 + $0x184] ss:$48 sps:$4 sm:$0xff]   ;;  %v3708_v10 = vld [vmem:[#allocation2 + $0x6c] ss:$48 sps:$4 sm:$0xff]  }
  0x2f   :  { %v3629_v18 = vld [vmem:[#allocation2 + $0x14] ss:$48 sps:$4 sm:$0xff]   ;;  %v3627_v19 = vld [vmem:[#allocation2 + $0x10] ss:$48 sps:$4 sm:$0xff]   ;;  %vm3129_vm8 = vcmask 31768  }
  0x30   :  { %1540 = vmatpush1.bf16.msra.mxu1 %v3617_v11  ;;  %v3630_v21 = vld [vmem:[#allocation2 + $0x180] ss:$48 sps:$4 sm:$0xff]   ;;  %v3632_v22 = vld [vmem:[#allocation2 + $0x1e4] ss:$48 sps:$4 sm:$0xff]  }
  0x31   :  { %1581 = vmatpush1.bf16.msra.mxu0 %v3618_v12  ;;  %1541 = vmatprep.subr.bf16.mxu1 %v3619_v13  ;;  %v3636_v23 = vld [vmem:[#allocation2 + $0x74] ss:$48 sps:$4 sm:$0xff]   ;;  %v3634_v24 = vld [vmem:[#allocation2 + $0x70] ss:$48 sps:$4 sm:$0xff]   ;;  %v3706_v12 = vld [vmem:[#allocation2 + $0x68] ss:$48 sps:$4 sm:$0xff]  }
  0x32   :  { %1582 = vmatprep.subr.bf16.mxu0 %v3621_v14  ;;  %v3637_v25 = vld [vmem:[#allocation2 + $0x1e0] ss:$48 sps:$4 sm:$0xff]   ;;  %v3638_v26 = vld [vmem:[#allocation2 + $0x244] ss:$48 sps:$4 sm:$0xff]   ;;  %v3714_v14 = vld [vmem:[#allocation2 + $0xcc] ss:$48 sps:$4 sm:$0xff]  }
  0x33   :  { %v3642_v27 = vld [vmem:[#allocation2 + $0xd4] ss:$48 sps:$4 sm:$0xff]   ;;  %v3640_v28 = vld [vmem:[#allocation2 + $0xd0] ss:$48 sps:$4 sm:$0xff]  }
  0x34   :  { %1542 = vmatpush1.bf16.msra.mxu1 %v3623_v15  ;;  %v3643_v29 = vld [vmem:[#allocation2 + $0x240] ss:$48 sps:$4 sm:$0xff]   ;;  %v3644_v30 = vld [vmem:[#allocation2 + $0x2a4] ss:$48 sps:$4 sm:$0xff]  }
  0x35   :  { %1583 = vmatpush1.bf16.msra.mxu0 %v3624_v16  ;;  %1543 = vmatprep.subr.bf16.mxu1 %v3625_v17  ;;  %v3648_v31 = vld [vmem:[#allocation2 + $0x134] ss:$48 sps:$4 sm:$0xff]   ;;  %v3646_v32 = vld [vmem:[#allocation2 + $0x130] ss:$48 sps:$4 sm:$0xff]   ;;  %v3712_v16 = vld [vmem:[#allocation2 + $0xc8] ss:$48 sps:$4 sm:$0xff]  }
  0x36   :  { %1699 = vmatprep.subr.bf16.mxu0 %v3629_v18  ;;  %v3649_v33 = vld [vmem:[#allocation2 + $0x2a0] ss:$48 sps:$4 sm:$0xff]   ;;  %v3650_v34 = vld [vmem:[#allocation2 + $0x304] ss:$48 sps:$4 sm:$0xff]   ;;  %v3720_v18 = vld [vmem:[#allocation2 + $0x12c] ss:$48 sps:$4 sm:$0xff]  }
  0x37   :  { %v3654_v35 = vld [vmem:[#allocation2 + $0x194] ss:$48 sps:$4 sm:$0xff]   ;;  %v3652_v36 = vld [vmem:[#allocation2 + $0x190] ss:$48 sps:$4 sm:$0xff]  }
  0x38   :  { %3380 = vmatmul.mubr.msk.bf16.vlgmr.msra.gmra.mrb[0].mxu0 %vm1531_vm0, %v4296_v20  ;;  %1544 = vmatpush1.bf16.msra.mxu1 %v3630_v21  ;;  %v3655_v37 = vld [vmem:[#allocation2 + $0x300] ss:$48 sps:$4 sm:$0xff]   ;;  %v3656_v38 = vld [vmem:[#allocation2 + $0x364] ss:$48 sps:$4 sm:$0xff]   ;;  %v3718_v21 = vld [vmem:[#allocation2 + $0x128] ss:$48 sps:$4 sm:$0xff]  }
  0x39   :  { %1700 = vmatpush1.bf16.msra.mxu0 %v3627_v19  ;;  %1545 = vmatprep.subr.bf16.mxu1 %v3632_v22  ;;  %v3660_v39 = vld [vmem:[#allocation2 + $0x1f4] ss:$48 sps:$4 sm:$0xff]   ;;  %v3658_v40 = vld [vmem:[#allocation2 + $0x1f0] ss:$48 sps:$4 sm:$0xff]  }
  0x3a   :  { %1701 = vmatprep.subr.bf16.mxu0 %v3636_v23  ;;  %v3661_v41 = vld [vmem:[#allocation2 + $0x360] ss:$48 sps:$4 sm:$0xff]   ;;  %v3662_v42 = vld [vmem:[#allocation2 + $0x3c4] ss:$48 sps:$4 sm:$0xff]   ;;  %v3726_v23 = vld [vmem:[#allocation2 + $0x18c] ss:$48 sps:$4 sm:$0xff]  }
  0x3b   :  { %v3666_v43 = vld [vmem:[#allocation2 + $0x254] ss:$48 sps:$4 sm:$0xff]   ;;  %v3664_v44 = vld [vmem:[#allocation2 + $0x250] ss:$48 sps:$4 sm:$0xff]  }
  0x3c   :  { %1546 = vmatpush1.bf16.msra.mxu1 %v3637_v25  ;;  %v3667_v45 = vld [vmem:[#allocation2 + $0x3c0] ss:$48 sps:$4 sm:$0xff]   ;;  %v3668_v46 = vld [vmem:[#allocation2 + $0x424] ss:$48 sps:$4 sm:$0xff]   ;;  %v3724_v25 = vld [vmem:[#allocation2 + $0x188] ss:$48 sps:$4 sm:$0xff]  }
  0x3d   :  { %1702 = vmatpush1.bf16.msra.mxu0 %v3634_v24  ;;  %1547 = vmatprep.subr.bf16.mxu1 %v3638_v26  ;;  %v3672_v47 = vld [vmem:[#allocation2 + $0x2b4] ss:$48 sps:$4 sm:$0xff]   ;;  %v3670_v48 = vld [vmem:[#allocation2 + $0x2b0] ss:$48 sps:$4 sm:$0xff]  }
  0x3e   :  { %1703 = vmatprep.subr.bf16.mxu0 %v3642_v27  ;;  %v79_v49 = vld [vmem:[%s4483_s0] sm:$0xff]  ;;  %v3732_v27 = vld [vmem:[#allocation2 + $0x1ec] ss:$48 sps:$4 sm:$0xff]  }
  0x3f   :  { %v3673_v50 = vld [vmem:[#allocation2 + $0x420] ss:$48 sps:$4 sm:$0xff]   ;;  %v3674_v51 = vld [vmem:[#allocation2 + $0x484] ss:$48 sps:$4 sm:$0xff]   ;;  %v4303_v52 = vcombine.high %v79_v49, %v79_v49  ;;  %v4307_v7 = vcombine.low %v79_v49, %v79_v49  ;;  %v3760_v49 = vld [vmem:[#allocation2 + $0x3c8] ss:$48 sps:$4 sm:$0xff]  }
  0x40   :  { %1548 = vmatpush1.bf16.msra.mxu1 %v3643_v29  ;;  %v3678_v53 = vld [vmem:[#allocation2 + $0x314] ss:$48 sps:$4 sm:$0xff]   ;;  %v3676_v54 = vld [vmem:[#allocation2 + $0x310] ss:$48 sps:$4 sm:$0xff]   ;;  %v3730_v29 = vld [vmem:[#allocation2 + $0x1e8] ss:$48 sps:$4 sm:$0xff]  }
  0x41   :  { %1704 = vmatpush1.bf16.msra.mxu0 %v3640_v28  ;;  %1549 = vmatprep.subr.bf16.mxu1 %v3644_v30  ;;  %v3679_v55 = vld [vmem:[#allocation2 + $0x480] ss:$48 sps:$4 sm:$0xff]   ;;  %v3680_v56 = vld [vmem:[#allocation2 + $0x4e4] ss:$48 sps:$4 sm:$0xff]  }
  0x42   :  { %1705 = vmatprep.subr.bf16.mxu0 %v3648_v31  ;;  %1567 = vmatprep.mubr.bf16.mxu1 %v4303_v52  ;;  %v3684_v57 = vld [vmem:[#allocation2 + $0x374] ss:$48 sps:$4 sm:$0xff]   ;;  %v3682_v58 = vld [vmem:[#allocation2 + $0x370] ss:$48 sps:$4 sm:$0xff]   ;;  %v3738_v31 = vld [vmem:[#allocation2 + $0x24c] ss:$48 sps:$4 sm:$0xff]  }
  0x43   :  { %1731 = vmatprep.mubr.bf16.mxu0 %v4303_v52  ;;  %v3685_v59 = vld [vmem:[#allocation2 + $0x4e0] ss:$48 sps:$4 sm:$0xff]   ;;  %v3686_v60 = vld [vmem:[#allocation2 + $0x544] ss:$48 sps:$4 sm:$0xff]  }
  0x44   :  { %1550 = vmatpush1.bf16.msra.mxu1 %v3649_v33  ;;  %v3690_v61 = vld [vmem:[#allocation2 + $0x3d4] ss:$48 sps:$4 sm:$0xff]   ;;  %v3688_v62 = vld [vmem:[#allocation2 + $0x3d0] ss:$48 sps:$4 sm:$0xff]   ;;  %v3736_v33 = vld [vmem:[#allocation2 + $0x248] ss:$48 sps:$4 sm:$0xff]  }
  0x45   :  { %1706 = vmatpush1.bf16.msra.mxu0 %v3646_v32  ;;  %1551 = vmatprep.subr.bf16.mxu1 %v3650_v34  ;;  %v3691_v63 = vld [vmem:[#allocation2 + $0x540] ss:$48 sps:$4 sm:$0xff]   ;;  %v3692_v1 = vld [vmem:[#allocation2 + $0x5a4] ss:$48 sps:$4 sm:$0xff]  }
  0x46   :  { %1707 = vmatprep.subr.bf16.mxu0 %v3654_v35  ;;  %v3696_v2 = vld [vmem:[#allocation2 + $0x434] ss:$48 sps:$4 sm:$0xff]   ;;  %v3694_v3 = vld [vmem:[#allocation2 + $0x430] ss:$48 sps:$4 sm:$0xff]   ;;  %v3744_v35 = vld [vmem:[#allocation2 + $0x2ac] ss:$48 sps:$4 sm:$0xff]  }
  0x47   :  { %v3697_v4 = vld [vmem:[#allocation2 + $0x5a0] ss:$48 sps:$4 sm:$0xff]   ;;  %v3705_v6 = vld [vmem:[#allocation2 + $0x494] ss:$48 sps:$4 sm:$0xff]  }
  0x48   :  { %1552 = vmatpush1.bf16.msra.mxu1 %v3655_v37  ;;  %v3703_v9 = vld [vmem:[#allocation2 + $0x490] ss:$48 sps:$4 sm:$0xff]   ;;  %v3711_v11 = vld [vmem:[#allocation2 + $0x4f4] ss:$48 sps:$4 sm:$0xff]   ;;  %v3742_v37 = vld [vmem:[#allocation2 + $0x2a8] ss:$48 sps:$4 sm:$0xff]  }
  0x49   :  { %1708 = vmatpush1.bf16.msra.mxu0 %v3652_v36  ;;  %1553 = vmatprep.subr.bf16.mxu1 %v3656_v38  ;;  %v3709_v13 = vld [vmem:[#allocation2 + $0x4f0] ss:$48 sps:$4 sm:$0xff]   ;;  %v3717_v15 = vld [vmem:[#allocation2 + $0x554] ss:$48 sps:$4 sm:$0xff]  }
  0x4a   :  { %1709 = vmatprep.subr.bf16.mxu0 %v3660_v39  ;;  %v3715_v17 = vld [vmem:[#allocation2 + $0x550] ss:$48 sps:$4 sm:$0xff]   ;;  %v3723_v19 = vld [vmem:[#allocation2 + $0x5b4] ss:$48 sps:$4 sm:$0xff]   ;;  %v3750_v39 = vld [vmem:[#allocation2 + $0x30c] ss:$48 sps:$4 sm:$0xff]  }
  0x4b   :  { %v3721_v22 = vld [vmem:[#allocation2 + $0x5b0] ss:$48 sps:$4 sm:$0xff]   ;;  %v3729_v24 = vld [vmem:[#allocation2 + $0x614] ss:$48 sps:$4 sm:$0xff]  }
  0x4c   :  { %1554 = vmatpush1.bf16.msra.mxu1 %v3661_v41  ;;  %v3727_v26 = vld [vmem:[#allocation2 + $0x610] ss:$48 sps:$4 sm:$0xff]   ;;  %v3735_v28 = vld [vmem:[#allocation2 + $0x674] ss:$48 sps:$4 sm:$0xff]   ;;  %v3748_v41 = vld [vmem:[#allocation2 + $0x308] ss:$48 sps:$4 sm:$0xff]  }
  0x4d   :  { %1710 = vmatpush1.bf16.msra.mxu0 %v3658_v40  ;;  %1555 = vmatprep.subr.bf16.mxu1 %v3662_v42  ;;  %v3733_v30 = vld [vmem:[#allocation2 + $0x670] ss:$48 sps:$4 sm:$0xff]   ;;  %v3741_v32 = vld [vmem:[#allocation2 + $0x6d4] ss:$48 sps:$4 sm:$0xff]  }
  0x4e   :  { %1711 = vmatprep.subr.bf16.mxu0 %v3666_v43  ;;  %v3739_v34 = vld [vmem:[#allocation2 + $0x6d0] ss:$48 sps:$4 sm:$0xff]   ;;  %v3747_v36 = vld [vmem:[#allocation2 + $0x734] ss:$48 sps:$4 sm:$0xff]   ;;  %v3756_v43 = vld [vmem:[#allocation2 + $0x36c] ss:$48 sps:$4 sm:$0xff]  }
  0x4f   :  { %v3745_v38 = vld [vmem:[#allocation2 + $0x730] ss:$48 sps:$4 sm:$0xff]   ;;  %v3753_v40 = vld [vmem:[#allocation2 + $0x24] ss:$48 sps:$4 sm:$0xff]  }
  0x50   :  { %1556 = vmatpush1.bf16.msra.mxu1 %v3667_v45  ;;  %v3751_v42 = vld [vmem:[#allocation2 + $0x20] ss:$48 sps:$4 sm:$0xff]   ;;  %v3754_v45 = vld [vmem:[#allocation2 + $0x368] ss:$48 sps:$4 sm:$0xff]  }
  0x51   :  { %1712 = vmatpush1.bf16.msra.mxu0 %v3664_v44  ;;  %1557 = vmatprep.subr.bf16.mxu1 %v3668_v46  ;;  %v3759_v44 = vld [vmem:[#allocation2 + $0x84] ss:$48 sps:$4 sm:$0xff]   ;;  %v3757_v46 = vld [vmem:[#allocation2 + $0x80] ss:$48 sps:$4 sm:$0xff]  }
  0x52   :  { %1713 = vmatprep.subr.bf16.mxu0 %v3672_v47  ;;  %v3762_v47 = vld [vmem:[#allocation2 + $0x3cc] ss:$48 sps:$4 sm:$0xff]  }
  0x54   :  { %1558 = vmatpush1.bf16.msra.mxu1 %v3673_v50  ;;  %v3763_v50 = vld [vmem:[#allocation2 + $0xe0] ss:$48 sps:$4 sm:$0xff]  }
  0x55   :  { %1714 = vmatpush1.bf16.msra.mxu0 %v3670_v48  ;;  %1559 = vmatprep.subr.bf16.mxu1 %v3674_v51  ;;  %v3765_v48 = vld [vmem:[#allocation2 + $0xe4] ss:$48 sps:$4 sm:$0xff]   ;;  %v3768_v51 = vld [vmem:[#allocation2 + $0x42c] ss:$48 sps:$4 sm:$0xff]  }
  0x56   :  { %1715 = vmatprep.subr.bf16.mxu0 %v3678_v53  ;;  %v3771_v53 = vld [vmem:[#allocation2 + $0x144] ss:$48 sps:$4 sm:$0xff]  }
  0x58   :  { %1560 = vmatpush1.bf16.msra.mxu1 %v3679_v55  ;;  %v3769_v55 = vld [vmem:[#allocation2 + $0x140] ss:$48 sps:$4 sm:$0xff]  }
  0x59   :  { %1716 = vmatpush1.bf16.msra.mxu0 %v3676_v54  ;;  %1561 = vmatprep.subr.bf16.mxu1 %v3680_v56  ;;  %v3766_v54 = vld [vmem:[#allocation2 + $0x428] ss:$48 sps:$4 sm:$0xff]   ;;  %v3774_v56 = vld [vmem:[#allocation2 + $0x48c] ss:$48 sps:$4 sm:$0xff]  }
  0x5a   :  { %1717 = vmatprep.subr.bf16.mxu0 %v3684_v57  ;;  %v3777_v57 = vld [vmem:[#allocation2 + $0x1a4] ss:$48 sps:$4 sm:$0xff]  }
  0x5c   :  { %1562 = vmatpush1.bf16.msra.mxu1 %v3685_v59  ;;  %v3775_v59 = vld [vmem:[#allocation2 + $0x1a0] ss:$48 sps:$4 sm:$0xff]  }
  0x5d   :  { %1718 = vmatpush1.bf16.msra.mxu0 %v3682_v58  ;;  %1563 = vmatprep.subr.bf16.mxu1 %v3686_v60  ;;  %v3772_v58 = vld [vmem:[#allocation2 + $0x488] ss:$48 sps:$4 sm:$0xff]   ;;  %v3780_v60 = vld [vmem:[#allocation2 + $0x4ec] ss:$48 sps:$4 sm:$0xff]  }
  0x5e   :  { %1719 = vmatprep.subr.bf16.mxu0 %v3690_v61  ;;  %v3783_v61 = vld [vmem:[#allocation2 + $0x204] ss:$48 sps:$4 sm:$0xff]  }
  0x60   :  { %1564 = vmatpush1.bf16.msra.mxu1 %v3691_v63  ;;  %v3781_v63 = vld [vmem:[#allocation2 + $0x200] ss:$48 sps:$4 sm:$0xff]  }
  0x61   :  { %1720 = vmatpush1.bf16.msra.mxu0 %v3688_v62  ;;  %1565 = vmatprep.subr.bf16.mxu1 %v3692_v1  ;;  %v3778_v62 = vld [vmem:[#allocation2 + $0x4e8] ss:$48 sps:$4 sm:$0xff]   ;;  %v3786_v1 = vld [vmem:[#allocation2 + $0x54c] ss:$48 sps:$4 sm:$0xff]  }
  0x62   :  { %1721 = vmatprep.subr.bf16.mxu0 %v3696_v2  ;;  %v3789_v2 = vld [vmem:[#allocation2 + $0x264] ss:$48 sps:$4 sm:$0xff]  }
  0x64   :  { %1566 = vmatpush1.bf16.msra.mxu1 %v3697_v4  ;;  %v3787_v4 = vld [vmem:[#allocation2 + $0x260] ss:$48 sps:$4 sm:$0xff]  }
  0x65   :  { %1722 = vmatpush1.bf16.msra.mxu0 %v3694_v3  ;;  %1617 = vmatprep.subr.bf16.mxu1 %v3702_v5  ;;  %v3784_v3 = vld [vmem:[#allocation2 + $0x548] ss:$48 sps:$4 sm:$0xff]   ;;  %v3792_v5 = vld [vmem:[#allocation2 + $0x5ac] ss:$48 sps:$4 sm:$0xff]  }
  0x66   :  { %1723 = vmatprep.subr.bf16.mxu0 %v3705_v6  ;;  %v3795_v6 = vld [vmem:[#allocation2 + $0x2c4] ss:$48 sps:$4 sm:$0xff]  }
  0x67   :  { %1568 = vmatmul.mubr.bf16.vlgmr.msra.gmra.mrb[0].mxu1 %v4307_v7 }
  0x68   :  { %1618 = vmatpush1.bf16.msra.mxu1 %v3700_v8  ;;  %1649 = vmatprep.mubr.bf16.mxu1 %v4303_v52  ;;  %v3790_v8 = vld [vmem:[#allocation2 + $0x5a8] ss:$48 sps:$4 sm:$0xff]  }
  0x69   :  { %1724 = vmatpush1.bf16.msra.mxu0 %v3703_v9  ;;  %1619 = vmatprep.subr.bf16.mxu1 %v3708_v10  ;;  %v3793_v9 = vld [vmem:[#allocation2 + $0x2c0] ss:$48 sps:$4 sm:$0xff]   ;;  %v3798_v10 = vld [vmem:[#allocation2 + $0x60c] ss:$48 sps:$4 sm:$0xff]  }
  0x6a   :  { %1725 = vmatprep.subr.bf16.mxu0 %v3711_v11  ;;  %v3801_v11 = vld [vmem:[#allocation2 + $0x324] ss:$48 sps:$4 sm:$0xff]  }
  0x6c   :  { %1620 = vmatpush1.bf16.msra.mxu1 %v3706_v12  ;;  %v3796_v12 = vld [vmem:[#allocation2 + $0x608] ss:$48 sps:$4 sm:$0xff]  }
  0x6d   :  { %1726 = vmatpush1.bf16.msra.mxu0 %v3709_v13  ;;  %1621 = vmatprep.subr.bf16.mxu1 %v3714_v14  ;;  %v3799_v13 = vld [vmem:[#allocation2 + $0x320] ss:$48 sps:$4 sm:$0xff]   ;;  %v3804_v14 = vld [vmem:[#allocation2 + $0x66c] ss:$48 sps:$4 sm:$0xff]  }
  0x6e   :  { %1727 = vmatprep.subr.bf16.mxu0 %v3717_v15  ;;  %v3807_v15 = vld [vmem:[#allocation2 + $0x384] ss:$48 sps:$4 sm:$0xff]  }
  0x70   :  { %1622 = vmatpush1.bf16.msra.mxu1 %v3712_v16  ;;  %v3802_v16 = vld [vmem:[#allocation2 + $0x668] ss:$48 sps:$4 sm:$0xff]  }
  0x71   :  { %1728 = vmatpush1.bf16.msra.mxu0 %v3715_v17  ;;  %1623 = vmatprep.subr.bf16.mxu1 %v3720_v18  ;;  %v3805_v17 = vld [vmem:[#allocation2 + $0x380] ss:$48 sps:$4 sm:$0xff]   ;;  %v3810_v18 = vld [vmem:[#allocation2 + $0x6cc] ss:$48 sps:$4 sm:$0xff]  }
  0x72   :  { %1729 = vmatprep.subr.bf16.mxu0 %v3723_v19  ;;  %v3813_v19 = vld [vmem:[#allocation2 + $0x3e4] ss:$48 sps:$4 sm:$0xff]  }
  0x74   :  { %1624 = vmatpush1.bf16.msra.mxu1 %v3718_v21  ;;  %v3808_v21 = vld [vmem:[#allocation2 + $0x6c8] ss:$48 sps:$4 sm:$0xff]  }
  0x75   :  { %1730 = vmatpush1.bf16.msra.mxu0 %v3721_v22  ;;  %1625 = vmatprep.subr.bf16.mxu1 %v3726_v23  ;;  %v3811_v22 = vld [vmem:[#allocation2 + $0x3e0] ss:$48 sps:$4 sm:$0xff]   ;;  %v3816_v23 = vld [vmem:[#allocation2 + $0x72c] ss:$48 sps:$4 sm:$0xff]  }
  0x76   :  { %1740 = vmatprep.subr.bf16.mxu0 %v3729_v24  ;;  %v3819_v24 = vld [vmem:[#allocation2 + $0x444] ss:$48 sps:$4 sm:$0xff]  }
  0x78   :  { %1732 = vmatmul.mubr.bf16.vlgmr.msra.gmra.mrb[4].mxu0 %v4307_v7  ;;  %1626 = vmatpush1.bf16.msra.mxu1 %v3724_v25  ;;  %v3814_v25 = vld [vmem:[#allocation2 + $0x728] ss:$48 sps:$4 sm:$0xff]  }
  0x79   :  { %1741 = vmatpush1.bf16.msra.mxu0 %v3727_v26  ;;  %1627 = vmatprep.subr.bf16.mxu1 %v3732_v27  ;;  %v3817_v26 = vld [vmem:[#allocation2 + $0x440] ss:$48 sps:$4 sm:$0xff]   ;;  %v3822_v27 = vld [vmem:[#allocation2 + $0x1c] ss:$48 sps:$4 sm:$0xff]  }
  0x7a   :  { %1742 = vmatprep.subr.bf16.mxu0 %v3735_v28  ;;  %1772 = vmatprep.mubr.bf16.mxu0 %v4182_v0  ;;  %v3825_v28 = vld [vmem:[#allocation2 + $0x4a4] ss:$48 sps:$4 sm:$0xff]  }
  0x7c   :  { %1628 = vmatpush1.bf16.msra.mxu1 %v3730_v29  ;;  %v3820_v29 = vld [vmem:[#allocation2 + $0x18] ss:$48 sps:$4 sm:$0xff]  }
  0x7d   :  { %1743 = vmatpush1.bf16.msra.mxu0 %v3733_v30  ;;  %1629 = vmatprep.subr.bf16.mxu1 %v3738_v31  ;;  %v3823_v30 = vld [vmem:[#allocation2 + $0x4a0] ss:$48 sps:$4 sm:$0xff]   ;;  %v3828_v31 = vld [vmem:[#allocation2 + $0x7c] ss:$48 sps:$4 sm:$0xff]  }
  0x7e   :  { %1744 = vmatprep.subr.bf16.mxu0 %v3741_v32  ;;  %v3831_v32 = vld [vmem:[#allocation2 + $0x504] ss:$48 sps:$4 sm:$0xff]  }
  0x80   :  { %1630 = vmatpush1.bf16.msra.mxu1 %v3736_v33  ;;  %v3826_v33 = vld [vmem:[#allocation2 + $0x78] ss:$48 sps:$4 sm:$0xff]  }
  0x81   :  { %1745 = vmatpush1.bf16.msra.mxu0 %v3739_v34  ;;  %1631 = vmatprep.subr.bf16.mxu1 %v3744_v35  ;;  %v3829_v34 = vld [vmem:[#allocation2 + $0x500] ss:$48 sps:$4 sm:$0xff]   ;;  %v3834_v35 = vld [vmem:[#allocation2 + $0xdc] ss:$48 sps:$4 sm:$0xff]  }
  0x82   :  { %1746 = vmatprep.subr.bf16.mxu0 %v3747_v36  ;;  %v3837_v36 = vld [vmem:[#allocation2 + $0x564] ss:$48 sps:$4 sm:$0xff]  }
  0x84   :  { %1632 = vmatpush1.bf16.msra.mxu1 %v3742_v37  ;;  %v3832_v37 = vld [vmem:[#allocation2 + $0xd8] ss:$48 sps:$4 sm:$0xff]  }
  0x85   :  { %1747 = vmatpush1.bf16.msra.mxu0 %v3745_v38  ;;  %1633 = vmatprep.subr.bf16.mxu1 %v3750_v39  ;;  %v3835_v38 = vld [vmem:[#allocation2 + $0x560] ss:$48 sps:$4 sm:$0xff]   ;;  %v3840_v39 = vld [vmem:[#allocation2 + $0x13c] ss:$48 sps:$4 sm:$0xff]  }
  0x86   :  { %1863 = vmatprep.subr.bf16.mxu0 %v3753_v40  ;;  %v3843_v40 = vld [vmem:[#allocation2 + $0x5c4] ss:$48 sps:$4 sm:$0xff]  }
  0x88   :  { %3382 = vmatmul.mubr.msk.bf16.vlgmr.msra.gmra.mrb[4].mxu0 %vm1531_vm0, %v4296_v20  ;;  %1634 = vmatpush1.bf16.msra.mxu1 %v3748_v41  ;;  %v3838_v41 = vld [vmem:[#allocation2 + $0x138] ss:$48 sps:$4 sm:$0xff]  }
  0x89   :  { %1864 = vmatpush1.bf16.msra.mxu0 %v3751_v42  ;;  %1635 = vmatprep.subr.bf16.mxu1 %v3756_v43  ;;  %v3846_v42 = vld [vmem:[#allocation2 + $0x19c] ss:$48 sps:$4 sm:$0xff]   ;;  %v3849_v43 = vld [vmem:[#allocation2 + $0x624] ss:$48 sps:$4 sm:$0xff]  }
  0x8a   :  { %1865 = vmatprep.subr.bf16.mxu0 %v3759_v44  ;;  %1895 = vmatprep.mubr.bf16.mxu0 %v4303_v52  ;;  %v3844_v44 = vld [vmem:[#allocation2 + $0x198] ss:$48 sps:$4 sm:$0xff]  }
  0x8c   :  { %1636 = vmatpush1.bf16.msra.mxu1 %v3754_v45  ;;  %v3847_v45 = vld [vmem:[#allocation2 + $0x620] ss:$48 sps:$4 sm:$0xff]  }
  0x8d   :  { %1866 = vmatpush1.bf16.msra.mxu0 %v3757_v46  ;;  %1637 = vmatprep.subr.bf16.mxu1 %v3762_v47  ;;  %v3852_v46 = vld [vmem:[#allocation2 + $0x1fc] ss:$48 sps:$4 sm:$0xff]   ;;  %v3855_v47 = vld [vmem:[#allocation2 + $0x684] ss:$48 sps:$4 sm:$0xff]  }
  0x8e   :  { %1867 = vmatprep.subr.bf16.mxu0 %v3765_v48  ;;  %v3850_v48 = vld [vmem:[#allocation2 + $0x1f8] ss:$48 sps:$4 sm:$0xff]  }
  0x90   :  { %1638 = vmatpush1.bf16.msra.mxu1 %v3760_v49  ;;  %v3853_v49 = vld [vmem:[#allocation2 + $0x680] ss:$48 sps:$4 sm:$0xff]  }
  0x91   :  { %1868 = vmatpush1.bf16.msra.mxu0 %v3763_v50  ;;  %1639 = vmatprep.subr.bf16.mxu1 %v3768_v51  ;;  %v3858_v50 = vld [vmem:[#allocation2 + $0x25c] ss:$48 sps:$4 sm:$0xff]   ;;  %v3861_v51 = vld [vmem:[#allocation2 + $0x6e4] ss:$48 sps:$4 sm:$0xff]  }
  0x92   :  { %1869 = vmatprep.subr.bf16.mxu0 %v3771_v53  ;;  %v3856_v53 = vld [vmem:[#allocation2 + $0x258] ss:$48 sps:$4 sm:$0xff]  }
  0x94   :  { %1640 = vmatpush1.bf16.msra.mxu1 %v3766_v54  ;;  %v3859_v54 = vld [vmem:[#allocation2 + $0x6e0] ss:$48 sps:$4 sm:$0xff]  }
  0x95   :  { %1870 = vmatpush1.bf16.msra.mxu0 %v3769_v55  ;;  %1641 = vmatprep.subr.bf16.mxu1 %v3774_v56  ;;  %v3864_v55 = vld [vmem:[#allocation2 + $0x2bc] ss:$48 sps:$4 sm:$0xff]   ;;  %v3867_v56 = vld [vmem:[#allocation2 + $0x744] ss:$48 sps:$4 sm:$0xff]  }
  0x96   :  { %1871 = vmatprep.subr.bf16.mxu0 %v3777_v57  ;;  %v3862_v57 = vld [vmem:[#allocation2 + $0x2b8] ss:$48 sps:$4 sm:$0xff]  }
  0x98   :  { %1642 = vmatpush1.bf16.msra.mxu1 %v3772_v58  ;;  %v3865_v58 = vld [vmem:[#allocation2 + $0x740] ss:$48 sps:$4 sm:$0xff]  }
  0x99   :  { %1872 = vmatpush1.bf16.msra.mxu0 %v3775_v59  ;;  %1643 = vmatprep.subr.bf16.mxu1 %v3780_v60  ;;  %v3870_v59 = vld [vmem:[#allocation2 + $0x31c] ss:$48 sps:$4 sm:$0xff]   ;;  %v3868_v60 = vld [vmem:[#allocation2 + $0x318] ss:$48 sps:$4 sm:$0xff]  }
  0x9a   :  { %1873 = vmatprep.subr.bf16.mxu0 %v3783_v61  ;;  %v3873_v61 = vld [vmem:[#allocation2 + $0x37c] ss:$48 sps:$4 sm:$0xff]  }
  0x9c   :  { %1644 = vmatpush1.bf16.msra.mxu1 %v3778_v62  ;;  %v3871_v62 = vld [vmem:[#allocation2 + $0x378] ss:$48 sps:$4 sm:$0xff]  }
  0x9d   :  { %1874 = vmatpush1.bf16.msra.mxu0 %v3781_v63  ;;  %1645 = vmatprep.subr.bf16.mxu1 %v3786_v1  ;;  %v4326_v63 = vld [vmem:[%s4483_s0 + $0x8] ss:$0 sps:$4 sm:$0xff]   ;;  %v3876_v1 = vld [vmem:[#allocation2 + $0x3dc] ss:$48 sps:$4 sm:$0xff]  }
  0x9e   :  { %1875 = vmatprep.subr.bf16.mxu0 %v3789_v2  ;;  %v3874_v2 = vld [vmem:[#allocation2 + $0x3d8] ss:$48 sps:$4 sm:$0xff]  }
  0xa0   :  { %1646 = vmatpush1.bf16.msra.mxu1 %v3784_v3  ;;  %v3879_v3 = vld [vmem:[#allocation2 + $0x43c] ss:$48 sps:$4 sm:$0xff]  }
  0xa1   :  { %1876 = vmatpush1.bf16.msra.mxu0 %v3787_v4  ;;  %1647 = vmatprep.subr.bf16.mxu1 %v3792_v5  ;;  %v3877_v4 = vld [vmem:[#allocation2 + $0x438] ss:$48 sps:$4 sm:$0xff]   ;;  %v3882_v5 = vld [vmem:[#allocation2 + $0x49c] ss:$48 sps:$4 sm:$0xff]  }
  0xa2   :  { %1877 = vmatprep.subr.bf16.mxu0 %v3795_v6  ;;  %v3880_v6 = vld [vmem:[#allocation2 + $0x498] ss:$48 sps:$4 sm:$0xff]  }
  0xa4   :  { %1648 = vmatpush1.bf16.msra.mxu1 %v3790_v8  ;;  %v3885_v8 = vld [vmem:[#allocation2 + $0x4fc] ss:$48 sps:$4 sm:$0xff]  }
  0xa5   :  { %1878 = vmatpush1.bf16.msra.mxu0 %v3793_v9  ;;  %1658 = vmatprep.subr.bf16.mxu1 %v3798_v10  ;;  %v3883_v9 = vld [vmem:[#allocation2 + $0x4f8] ss:$48 sps:$4 sm:$0xff]   ;;  %v3888_v10 = vld [vmem:[#allocation2 + $0x55c] ss:$48 sps:$4 sm:$0xff]  }
  0xa6   :  { %1879 = vmatprep.subr.bf16.mxu0 %v3801_v11  ;;  %v3886_v11 = vld [vmem:[#allocation2 + $0x558] ss:$48 sps:$4 sm:$0xff]  }
  0xa7   :  { %1650 = vmatmul.mubr.bf16.vlgmr.msra.gmra.mrb[4].mxu1 %v4307_v7 }
  0xa8   :  { %1659 = vmatpush1.bf16.msra.mxu1 %v3796_v12  ;;  %1690 = vmatprep.mubr.bf16.mxu1 %v4182_v0  ;;  %v3891_v12 = vld [vmem:[#allocation2 + $0x5bc] ss:$48 sps:$4 sm:$0xff]  }
  0xa9   :  { %1880 = vmatpush1.bf16.msra.mxu0 %v3799_v13  ;;  %1660 = vmatprep.subr.bf16.mxu1 %v3804_v14  ;;  %v3889_v13 = vld [vmem:[#allocation2 + $0x5b8] ss:$48 sps:$4 sm:$0xff]   ;;  %v3894_v14 = vld [vmem:[#allocation2 + $0x61c] ss:$48 sps:$4 sm:$0xff]  }
  0xaa   :  { %1881 = vmatprep.subr.bf16.mxu0 %v3807_v15  ;;  %v3892_v15 = vld [vmem:[#allocation2 + $0x618] ss:$48 sps:$4 sm:$0xff]  }
  0xac   :  { %1661 = vmatpush1.bf16.msra.mxu1 %v3802_v16  ;;  %v3897_v16 = vld [vmem:[#allocation2 + $0x67c] ss:$48 sps:$4 sm:$0xff]  }
  0xad   :  { %1882 = vmatpush1.bf16.msra.mxu0 %v3805_v17  ;;  %1662 = vmatprep.subr.bf16.mxu1 %v3810_v18  ;;  %v3895_v17 = vld [vmem:[#allocation2 + $0x678] ss:$48 sps:$4 sm:$0xff]   ;;  %v3900_v18 = vld [vmem:[#allocation2 + $0x6dc] ss:$48 sps:$4 sm:$0xff]  }
  0xae   :  { %1883 = vmatprep.subr.bf16.mxu0 %v3813_v19  ;;  %v3898_v19 = vld [vmem:[#allocation2 + $0x6d8] ss:$48 sps:$4 sm:$0xff]  }
  0xb0   :  { %1663 = vmatpush1.bf16.msra.mxu1 %v3808_v21  ;;  %v3903_v21 = vld [vmem:[#allocation2 + $0x73c] ss:$48 sps:$4 sm:$0xff]  }
  0xb1   :  { %1884 = vmatpush1.bf16.msra.mxu0 %v3811_v22  ;;  %1664 = vmatprep.subr.bf16.mxu1 %v3816_v23  ;;  %v3901_v22 = vld [vmem:[#allocation2 + $0x738] ss:$48 sps:$4 sm:$0xff]   ;;  %v3906_v23 = vld [vmem:[#allocation2 + $0x2c] ss:$48 sps:$4 sm:$0xff]  }
  0xb2   :  { %1885 = vmatprep.subr.bf16.mxu0 %v3819_v24  ;;  %v3904_v24 = vld [vmem:[#allocation2 + $0x28] ss:$48 sps:$4 sm:$0xff]  }
  0xb4   :  { %1665 = vmatpush1.bf16.msra.mxu1 %v3814_v25  ;;  %v3909_v25 = vld [vmem:[#allocation2 + $0x8c] ss:$48 sps:$4 sm:$0xff]  }
  0xb5   :  { %1886 = vmatpush1.bf16.msra.mxu0 %v3817_v26  ;;  %1781 = vmatprep.subr.bf16.mxu1 %v3822_v27  ;;  %v3907_v26 = vld [vmem:[#allocation2 + $0x88] ss:$48 sps:$4 sm:$0xff]   ;;  %v3912_v27 = vld [vmem:[#allocation2 + $0xec] ss:$48 sps:$4 sm:$0xff]  }
  0xb6   :  { %1887 = vmatprep.subr.bf16.mxu0 %v3825_v28 }
  0xb7   :  { %3381 = vmatmul.mubr.msk.bf16.vlgmr.msra.gmra.mrb[4].mxu1 %vm1531_vm0, %v4296_v20  ;;  %v3841_v20 = vld [vmem:[#allocation2 + $0x5c0] ss:$48 sps:$4 sm:$0xff]  }
  0xb8   :  { %1782 = vmatpush1.bf16.msra.mxu1 %v3820_v29  ;;  %1813 = vmatprep.mubr.bf16.mxu1 %v4303_v52 }
  0xb9   :  { %1888 = vmatpush1.bf16.msra.mxu0 %v3823_v30  ;;  %1783 = vmatprep.subr.bf16.mxu1 %v3828_v31  ;;  %v3910_v30 = vld [vmem:[#allocation2 + $0xe8] ss:$48 sps:$4 sm:$0xff]   ;;  %v3915_v31 = vld [vmem:[#allocation2 + $0x14c] ss:$48 sps:$4 sm:$0xff]  }
  0xba   :  { %1889 = vmatprep.subr.bf16.mxu0 %v3831_v32 }
  0xbc   :  { %1784 = vmatpush1.bf16.msra.mxu1 %v3826_v33 }
  0xbd   :  { %1890 = vmatpush1.bf16.msra.mxu0 %v3829_v34  ;;  %1785 = vmatprep.subr.bf16.mxu1 %v3834_v35  ;;  %v3964_v34 = vld [vmem:[#allocation4] ss:$8 sps:$4 sm:$0xff]   ;;  %v3966_v35 = vld [vmem:[#allocation4 + $0x4] ss:$8 sps:$4 sm:$0xff]  }
  0xbe   :  { %1891 = vmatprep.subr.bf16.mxu0 %v3837_v36  ;;  %v3969_v36 = vld [vmem:[#allocation4 + $0x14] ss:$8 sps:$4 sm:$0xff]  }
  0xc0   :  { %1786 = vmatpush1.bf16.msra.mxu1 %v3832_v37  ;;  %v3913_v37 = vld [vmem:[#allocation2 + $0x148] ss:$48 sps:$4 sm:$0xff]  }
  0xc1   :  { %1892 = vmatpush1.bf16.msra.mxu0 %v3835_v38  ;;  %1787 = vmatprep.subr.bf16.mxu1 %v3840_v39  ;;  %v3918_v38 = vld [vmem:[#allocation2 + $0x1ac] ss:$48 sps:$4 sm:$0xff]   ;;  %v3916_v39 = vld [vmem:[#allocation2 + $0x1a8] ss:$48 sps:$4 sm:$0xff]  }
  0xc2   :  { %1893 = vmatprep.subr.bf16.mxu0 %v3843_v40  ;;  %v3921_v40 = vld [vmem:[#allocation2 + $0x20c] ss:$48 sps:$4 sm:$0xff]  }
  0xc4   :  { %1788 = vmatpush1.bf16.msra.mxu1 %v3838_v41  ;;  %v3919_v41 = vld [vmem:[#allocation2 + $0x208] ss:$48 sps:$4 sm:$0xff]  }
  0xc5   :  { %1894 = vmatpush1.bf16.msra.mxu0 %v3841_v20  ;;  %1789 = vmatprep.subr.bf16.mxu1 %v3846_v42  ;;  %v3924_v20 = vld [vmem:[#allocation2 + $0x26c] ss:$48 sps:$4 sm:$0xff]   ;;  %v3922_v42 = vld [vmem:[#allocation2 + $0x268] ss:$48 sps:$4 sm:$0xff]  }
  0xc6   :  { %1904 = vmatprep.subr.bf16.mxu0 %v3849_v43  ;;  %v3927_v43 = vld [vmem:[#allocation2 + $0x2cc] ss:$48 sps:$4 sm:$0xff]  }
  0xc8   :  { %1896 = vmatmul.mubr.bf16.vlgmr.msra.gmra.mrb[8].mxu0 %v4307_v7  ;;  %1790 = vmatpush1.bf16.msra.mxu1 %v3844_v44  ;;  %v3925_v44 = vld [vmem:[#allocation2 + $0x2c8] ss:$48 sps:$4 sm:$0xff]  }
  0xc9   :  { %1905 = vmatpush1.bf16.msra.mxu0 %v3847_v45  ;;  %1791 = vmatprep.subr.bf16.mxu1 %v3852_v46  ;;  %v3930_v45 = vld [vmem:[#allocation2 + $0x32c] ss:$48 sps:$4 sm:$0xff]   ;;  %v3928_v46 = vld [vmem:[#allocation2 + $0x328] ss:$48 sps:$4 sm:$0xff]  }
  0xca   :  { %1906 = vmatprep.subr.bf16.mxu0 %v3855_v47  ;;  %1936 = vmatprep.mubr.bf16.mxu0 %v4182_v0  ;;  %v3933_v47 = vld [vmem:[#allocation2 + $0x38c] ss:$48 sps:$4 sm:$0xff]  }
  0xcc   :  { %1792 = vmatpush1.bf16.msra.mxu1 %v3850_v48  ;;  %v3931_v48 = vld [vmem:[#allocation2 + $0x388] ss:$48 sps:$4 sm:$0xff]  }
  0xcd   :  { %1907 = vmatpush1.bf16.msra.mxu0 %v3853_v49  ;;  %1793 = vmatprep.subr.bf16.mxu1 %v3858_v50  ;;  %v3936_v49 = vld [vmem:[#allocation2 + $0x3ec] ss:$48 sps:$4 sm:$0xff]  }
  0xce   :  { %1908 = vmatprep.subr.bf16.mxu0 %v3861_v51  ;;  %v3972_v50 = vld [vmem:[#allocation4 + $0x24] ss:$8 sps:$4 sm:$0xff]   ;;  %v3970_v51 = vld [vmem:[#allocation4 + $0x20] ss:$8 sps:$4 sm:$0xff]  }
  0xd0   :  { %1794 = vmatpush1.bf16.msra.mxu1 %v3856_v53  ;;  %v3934_v53 = vld [vmem:[#allocation2 + $0x3e8] ss:$48 sps:$4 sm:$0xff]  }
  0xd1   :  { %1909 = vmatpush1.bf16.msra.mxu0 %v3859_v54  ;;  %1795 = vmatprep.subr.bf16.mxu1 %v3864_v55  ;;  %v3939_v54 = vld [vmem:[#allocation2 + $0x44c] ss:$48 sps:$4 sm:$0xff]  }
  0xd2   :  { %1910 = vmatprep.subr.bf16.mxu0 %v3867_v56  ;;  %v3975_v55 = vld [vmem:[#allocation4 + $0x34] ss:$8 sps:$4 sm:$0xff]   ;;  %v3973_v56 = vld [vmem:[#allocation4 + $0x30] ss:$8 sps:$4 sm:$0xff]  }
  0xd4   :  { %1796 = vmatpush1.bf16.msra.mxu1 %v3862_v57  ;;  %v3937_v57 = vld [vmem:[#allocation2 + $0x448] ss:$48 sps:$4 sm:$0xff]  }
  0xd5   :  { %1911 = vmatpush1.bf16.msra.mxu0 %v3865_v58  ;;  %1797 = vmatprep.subr.bf16.mxu1 %v3870_v59  ;;  %v3942_v58 = vld [vmem:[#allocation2 + $0x4ac] ss:$48 sps:$4 sm:$0xff]   ;;  %v3976_v59 = vld [vmem:[#allocation4 + $0x40] ss:$8 sps:$4 sm:$0xff]  }
  0xd6   :  { %2659 = vmatprep.subr.bf16.mxu0 %v3966_v35  ;;  %v4002_v35 = vld [vmem:[#allocation4 + $0xc4] ss:$8 sps:$4 sm:$0xff]  }
  0xd8   :  { %3384 = vmatmul.mubr.msk.bf16.vlgmr.msra.gmra.mrb[8].mxu0 %vm1531_vm0, %v4326_v63  ;;  %1798 = vmatpush1.bf16.msra.mxu1 %v3868_v60  ;;  %v3978_v60 = vld [vmem:[#allocation4 + $0x44] ss:$8 sps:$4 sm:$0xff]  }
  0xd9   :  { %1799 = vmatprep.subr.bf16.mxu1 %v3873_v61  ;;  %2660 = vmatpush1.bf16.msra.mxu0 %v3964_v34  ;;  %v3981_v61 = vld [vmem:[#allocation4 + $0x54] ss:$8 sps:$4 sm:$0xff]   ;;  %v3997_v34 = vld [vmem:[#allocation4 + $0xb0] ss:$8 sps:$4 sm:$0xff]  }
  0xda   :  { %2661 = vmatprep.subr.bf16.mxu0 %v3969_v36  ;;  %v4000_v36 = vld [vmem:[#allocation4 + $0xc0] ss:$8 sps:$4 sm:$0xff]  }
  0xdc   :  { %1800 = vmatpush1.bf16.msra.mxu1 %v3871_v62  ;;  %v3940_v62 = vld [vmem:[#allocation2 + $0x4a8] ss:$48 sps:$4 sm:$0xff]  }
  0xdd   :  { %1801 = vmatprep.subr.bf16.mxu1 %v3876_v1  ;;  %v3945_v1 = vld [vmem:[#allocation2 + $0x50c] ss:$48 sps:$4 sm:$0xff]  }
  0xe0   :  { %1802 = vmatpush1.bf16.msra.mxu1 %v3874_v2  ;;  %v3979_v2 = vld [vmem:[#allocation4 + $0x50] ss:$8 sps:$4 sm:$0xff]  }
  0xe1   :  { %1803 = vmatprep.subr.bf16.mxu1 %v3879_v3  ;;  %v3984_v3 = vld [vmem:[#allocation4 + $0x64] ss:$8 sps:$4 sm:$0xff]  }
  0xe4   :  { %1804 = vmatpush1.bf16.msra.mxu1 %v3877_v4  ;;  %v3943_v4 = vld [vmem:[#allocation2 + $0x508] ss:$48 sps:$4 sm:$0xff]  }
  0xe5   :  { %1805 = vmatprep.subr.bf16.mxu1 %v3882_v5  ;;  %v3948_v5 = vld [vmem:[#allocation2 + $0x56c] ss:$48 sps:$4 sm:$0xff]  }
  0xe8   :  { %1806 = vmatpush1.bf16.msra.mxu1 %v3880_v6  ;;  %v3982_v6 = vld [vmem:[#allocation4 + $0x60] ss:$8 sps:$4 sm:$0xff]  }
  0xe9   :  { %1807 = vmatprep.subr.bf16.mxu1 %v3885_v8 }
  0xec   :  { %1808 = vmatpush1.bf16.msra.mxu1 %v3883_v9  ;;  %v3987_v9 = vld [vmem:[#allocation4 + $0x74] ss:$8 sps:$4 sm:$0xff]  }
  0xed   :  { %1809 = vmatprep.subr.bf16.mxu1 %v3888_v10 }
  0xf0   :  { %1810 = vmatpush1.bf16.msra.mxu1 %v3886_v11 }
  0xf1   :  { %1811 = vmatprep.subr.bf16.mxu1 %v3891_v12 }
  0xf4   :  { %1812 = vmatpush1.bf16.msra.mxu1 %v3889_v13 }
  0xf5   :  { %1822 = vmatprep.subr.bf16.mxu1 %v3894_v14  ;;  %v3946_v14 = vld [vmem:[#allocation2 + $0x568] ss:$48 sps:$4 sm:$0xff]  }
  0xf7   :  { %1814 = vmatmul.mubr.bf16.vlgmr.msra.gmra.mrb[8].mxu1 %v4307_v7 }
  0xf8   :  { %1823 = vmatpush1.bf16.msra.mxu1 %v3892_v15  ;;  %1854 = vmatprep.mubr.bf16.mxu1 %v4182_v0 }
  0xf9   :  { %1824 = vmatprep.subr.bf16.mxu1 %v3897_v16  ;;  %v3951_v16 = vld [vmem:[#allocation2 + $0x5cc] ss:$48 sps:$4 sm:$0xff]  }
  0xfc   :  { %1825 = vmatpush1.bf16.msra.mxu1 %v3895_v17  ;;  %v3985_v17 = vld [vmem:[#allocation4 + $0x70] ss:$8 sps:$4 sm:$0xff]  }
  0xfd   :  { %1826 = vmatprep.subr.bf16.mxu1 %v3900_v18  ;;  %v3990_v18 = vld [vmem:[#allocation4 + $0x84] ss:$8 sps:$4 sm:$0xff]  }
 0x100   :  { %1827 = vmatpush1.bf16.msra.mxu1 %v3898_v19  ;;  %v3949_v19 = vld [vmem:[#allocation2 + $0x5c8] ss:$48 sps:$4 sm:$0xff]  }
 0x101   :  { %1828 = vmatprep.subr.bf16.mxu1 %v3903_v21  ;;  %v3954_v21 = vld [vmem:[#allocation2 + $0x62c] ss:$48 sps:$4 sm:$0xff]  }
 0x104   :  { %1829 = vmatpush1.bf16.msra.mxu1 %v3901_v22  ;;  %v3988_v22 = vld [vmem:[#allocation4 + $0x80] ss:$8 sps:$4 sm:$0xff]  }
 0x105   :  { %1945 = vmatprep.subr.bf16.mxu1 %v3906_v23  ;;  %v3993_v23 = vld [vmem:[#allocation4 + $0x94] ss:$8 sps:$4 sm:$0xff]  }
 0x107   :  { %3383 = vmatmul.mubr.msk.bf16.vlgmr.msra.gmra.mrb[8].mxu1 %vm1531_vm0, %v4326_v63 }
 0x108   :  { %1946 = vmatpush1.bf16.msra.mxu1 %v3904_v24  ;;  %1977 = vmatprep.mubr.bf16.mxu1 %v4303_v52  ;;  %v3967_v52 = vld [vmem:[#allocation4 + $0x10] ss:$8 sps:$4 sm:$0xff]  }
 0x109   :  { %1947 = vmatprep.subr.bf16.mxu1 %v3909_v25  ;;  %2662 = vmatpush1.bf16.msra.mxu0 %v3967_v52  ;;  %v3952_v24 = vld [vmem:[#allocation2 + $0x628] ss:$48 sps:$4 sm:$0xff]   ;;  %v3957_v25 = vld [vmem:[#allocation2 + $0x68c] ss:$48 sps:$4 sm:$0xff]  }
 0x10a   :  { %2663 = vmatprep.subr.bf16.mxu0 %v3972_v50 }
 0x10b   :  { %v4335_v28 = vpop.f32.mrb[0].mxu0 }
 0x10c   :  { %v4337_v29 = vpop.f32.mrb[1].mxu0  ;;  %1948 = vmatpush1.bf16.msra.mxu1 %v3907_v26  ;;  %v3991_v26 = vld [vmem:[#allocation4 + $0x90] ss:$8 sps:$4 sm:$0xff]  }
 0x10d   :  { %v1614_v32 = vpop.f32.mrb[2].mxu0  ;;  %1949 = vmatprep.subr.bf16.mxu1 %v3912_v27  ;;  %2664 = vmatpush1.bf16.msra.mxu0 %v3970_v51  ;;  %v3996_v27 = vld [vmem:[#allocation4 + $0xa4] ss:$8 sps:$4 sm:$0xff]  }
 0x10e   :  { %v1615_v33 = vpop.f32.mrb[3].mxu0  ;;  %2665 = vmatprep.subr.bf16.mxu0 %v3975_v55  ;;  %v3958_v32 = vld [vmem:[#allocation2 + $0x6e8] ss:$48 sps:$4 sm:$0xff]   ;;  %v2035_v55 = vlaneseq }
 0x10f   :  { %v3963_v33 = vld [vmem:[#allocation2 + $0x74c] ss:$48 sps:$4 sm:$0xff]  }
 0x110   :  { %1950 = vmatpush1.bf16.msra.mxu1 %v3910_v30  ;;  %v3994_v30 = vld [vmem:[#allocation4 + $0xa0] ss:$8 sps:$4 sm:$0xff]  }
 0x111   :  { %1951 = vmatprep.subr.bf16.mxu1 %v3915_v31  ;;  %2666 = vmatpush1.bf16.msra.mxu0 %v3973_v56  ;;  %v3999_v31 = vld [vmem:[#allocation4 + $0xb4] ss:$8 sps:$4 sm:$0xff]   ;;  %v4359_v56 = vshrl.u32 %v2035_v55, 7 }
 0x112   :  { %2667 = vmatprep.subr.bf16.mxu0 %v3978_v60 }
 0x113   :  { %v2041_v60 = vsub.s32 1, %v4359_v56 }
 0x114   :  { %1952 = vmatpush1.bf16.msra.mxu1 %v3913_v37  ;;  %v4003_v37 = vld [vmem:[#allocation4 + $0xd0] ss:$8 sps:$4 sm:$0xff]  }
 0x115   :  { %1953 = vmatprep.subr.bf16.mxu1 %v3918_v38  ;;  %2668 = vmatpush1.bf16.msra.mxu0 %v3976_v59  ;;  %v4008_v38 = vld [vmem:[#allocation4 + $0xe4] ss:$8 sps:$4 sm:$0xff]   ;;  %v2037_v59 = vsub.s32 0, %v4359_v56 }
 0x116   :  { %2669 = vmatprep.subr.bf16.mxu0 %v3981_v61 }
 0x118   :  { %1954 = vmatpush1.bf16.msra.mxu1 %v3916_v39 }
 0x119   :  { %1955 = vmatprep.subr.bf16.mxu1 %v3921_v40  ;;  %2670 = vmatpush1.bf16.msra.mxu0 %v3979_v2  ;;  %v4006_v40 = vld [vmem:[#allocation4 + $0xe0] ss:$8 sps:$4 sm:$0xff]  }
 0x11a   :  { %2671 = vmatprep.subr.bf16.mxu0 %v3984_v3 }
 0x11c   :  { %1956 = vmatpush1.bf16.msra.mxu1 %v3919_v41 }
 0x11d   :  { %1957 = vmatprep.subr.bf16.mxu1 %v3924_v20  ;;  %2672 = vmatpush1.bf16.msra.mxu0 %v3982_v6 }
 0x11e   :  { %2673 = vmatprep.subr.bf16.mxu0 %v3987_v9 }
 0x120   :  { %1958 = vmatpush1.bf16.msra.mxu1 %v3922_v42  ;;  %v4011_v42 = vld [vmem:[#allocation4 + $0xf4] ss:$8 sps:$4 sm:$0xff]  }
 0x121   :  { %1959 = vmatprep.subr.bf16.mxu1 %v3927_v43  ;;  %2674 = vmatpush1.bf16.msra.mxu0 %v3985_v17  ;;  %v4009_v43 = vld [vmem:[#allocation4 + $0xf0] ss:$8 sps:$4 sm:$0xff]  }
 0x122   :  { %2675 = vmatprep.subr.bf16.mxu0 %v3990_v18  ;;  %v4012_v18 = vld [vmem:[#allocation4 + $0x100] ss:$8 sps:$4 sm:$0xff]  }
 0x124   :  { %1960 = vmatpush1.bf16.msra.mxu1 %v3925_v44  ;;  %v4014_v44 = vld [vmem:[#allocation4 + $0x104] ss:$8 sps:$4 sm:$0xff]  }
 0x125   :  { %1961 = vmatprep.subr.bf16.mxu1 %v3930_v45  ;;  %2676 = vmatpush1.bf16.msra.mxu0 %v3988_v22 }
 0x126   :  { %2677 = vmatprep.subr.bf16.mxu0 %v3993_v23  ;;  %v4183_v23 = vmov 0.0  }
 0x127   :  { %3110 = vst [vmem:[%s4498_s15] sm:$0xff] %v4183_v23 }
 0x128   :  { %1962 = vmatpush1.bf16.msra.mxu1 %v3928_v46 }
 0x129   :  { %1963 = vmatprep.subr.bf16.mxu1 %v3933_v47  ;;  %2678 = vmatpush1.bf16.msra.mxu0 %v3991_v26  ;;  %v4018_v26 = vld [vmem:[#allocation4 + $0x120] ss:$8 sps:$4 sm:$0xff]  }
 0x12a   :  { %2679 = vmatprep.subr.bf16.mxu0 %v3996_v27  ;;  %v4023_v27 = vld [vmem:[#allocation4 + $0x134] ss:$8 sps:$4 sm:$0xff]  }
 0x12c   :  { %1964 = vmatpush1.bf16.msra.mxu1 %v3931_v48 }
 0x12d   :  { %1965 = vmatprep.subr.bf16.mxu1 %v3936_v49  ;;  %2680 = vmatpush1.bf16.msra.mxu0 %v3994_v30  ;;  %v4026_v30 = vld [vmem:[#allocation4 + $0x144] ss:$8 sps:$4 sm:$0xff]  }
 0x12e   :  { %2681 = vmatprep.subr.bf16.mxu0 %v3999_v31  ;;  %v4111_v31 = vld [vmem:[%s4488_s5 + $0x18] sm:$0xff]  }
 0x130   :  { %1966 = vmatpush1.bf16.msra.mxu1 %v3934_v53 }
 0x131   :  { %1967 = vmatprep.subr.bf16.mxu1 %v3939_v54  ;;  %2682 = vmatpush1.bf16.msra.mxu0 %v3997_v34  ;;  %v4112_v34 = vld [vmem:[%s4488_s5 + $0x20] sm:$0xff]  }
 0x132   :  { %2683 = vmatprep.subr.bf16.mxu0 %v4002_v35  ;;  %v4027_v35 = vld [vmem:[#allocation4 + $0x150] ss:$8 sps:$4 sm:$0xff]  }
 0x134   :  { %1968 = vmatpush1.bf16.msra.mxu1 %v3937_v57  ;;  %v2049_v57 = vsub.s32 3, %v4359_v56 }
 0x135   :  { %1969 = vmatprep.subr.bf16.mxu1 %v3942_v58  ;;  %2684 = vmatpush1.bf16.msra.mxu0 %v4000_v36  ;;  %v4365_v58 = vld [vmem:[%s4485_s2] sm:$0x3f]  ;;  %v4113_v36 = vld [vmem:[%s4488_s5 + $0x28] sm:$0xff]  }
 0x136   :  { %v2050_v61 = vrot.slane %v4365_v58, %v2049_v57  ;;  %v2042_v2 = vrot.slane %v4365_v58, %v2041_v60  ;;  %v4056_v57 = vld [vmem:[#allocation4 + $0x1e4] ss:$8 sps:$4 sm:$0xff]  }
 0x138   :  { %1970 = vmatpush1.bf16.msra.mxu1 %v3940_v62  ;;  %v2038_v62 = vrot.slane %v4365_v58, %v2037_v59  ;;  %v4054_v59 = vld [vmem:[#allocation4 + $0x1e0] ss:$8 sps:$4 sm:$0xff]  }
 0x139   :  { %1971 = vmatprep.subr.bf16.mxu1 %v3945_v1 }
 0x13a   :  { %v1569_v8 = vpop.f32.mrb[0].mxu1 }
 0x13b   :  { %v4340_v10 = vadd.f32 %v4335_v28, %v1569_v8  ;;  %v1571_v11 = vpop.f32.mrb[1].mxu1  ;;  %v3955_v28 = vld [vmem:[#allocation2 + $0x688] ss:$48 sps:$4 sm:$0xff]  }
 0x13c   :  { %v4343_v12 = vadd.f32 %v4337_v29, %v1571_v11  ;;  %v1573_v13 = vpop.f32.mrb[2].mxu1  ;;  %1972 = vmatpush1.bf16.msra.mxu1 %v3943_v4  ;;  %v3960_v29 = vld [vmem:[#allocation2 + $0x6ec] ss:$48 sps:$4 sm:$0xff]  }
 0x13d   :  { %v1574_v15 = vpop.f32.mrb[3].mxu1  ;;  %1973 = vmatprep.subr.bf16.mxu1 %v3948_v5 }
 0x140   :  { %1974 = vmatpush1.bf16.msra.mxu1 %v3946_v14 }
 0x141   :  { %1975 = vmatprep.subr.bf16.mxu1 %v3951_v16 }
 0x144   :  { %1976 = vmatpush1.bf16.msra.mxu1 %v3949_v19 }
 0x145   :  { %1986 = vmatprep.subr.bf16.mxu1 %v3954_v21  ;;  %v4017_v21 = vld [vmem:[#allocation4 + $0x114] ss:$8 sps:$4 sm:$0xff]  }
 0x147   :  { %1978 = vmatmul.mubr.bf16.vlgmr.msra.gmra.mrb[12].mxu1 %v4307_v7  ;;  %v3961_v7 = vld [vmem:[#allocation2 + $0x748] ss:$48 sps:$4 sm:$0xff]  }
 0x148   :  { %1987 = vmatpush1.bf16.msra.mxu1 %v3952_v24  ;;  %2018 = vmatprep.mubr.bf16.mxu1 %v4182_v0  ;;  %v4005_v0 = vld [vmem:[#allocation4 + $0xd4] ss:$8 sps:$4 sm:$0xff]   ;;  %v4020_v24 = vld [vmem:[#allocation4 + $0x124] ss:$8 sps:$4 sm:$0xff]  }
 0x149   :  { %1988 = vmatprep.subr.bf16.mxu1 %v3957_v25  ;;  %2685 = vmatprep.subr.bf16.mxu0 %v4005_v0  ;;  %v4109_v25 = vld [vmem:[%s4488_s5 + $0x8] sm:$0xff]  }
 0x14a   :  { %2686 = vmatpush1.bf16.msra.mxu0 %v4003_v37  ;;  %v4030_v0 = vld [vmem:[#allocation4 + $0x160] ss:$8 sps:$4 sm:$0xff]   ;;  %v4035_v37 = vld [vmem:[#allocation4 + $0x174] ss:$8 sps:$4 sm:$0xff]  }
 0x14b   :  { %2687 = vmatprep.subr.bf16.mxu0 %v4008_v38  ;;  %v4033_v38 = vld [vmem:[#allocation4 + $0x170] ss:$8 sps:$4 sm:$0xff]  }
 0x14c   :  { %1989 = vmatpush1.bf16.msra.mxu1 %v3955_v28  ;;  %v4110_v28 = vld [vmem:[%s4488_s5 + $0x10] sm:$0xff]  }
 0x14d   :  { %1990 = vmatprep.subr.bf16.mxu1 %v3960_v29  ;;  %v4021_v29 = vld [vmem:[#allocation4 + $0x130] ss:$8 sps:$4 sm:$0xff]  }
 0x14e   :  { %2688 = vmatpush1.bf16.msra.mxu0 %v4006_v40  ;;  %v4038_v40 = vld [vmem:[#allocation4 + $0x184] ss:$8 sps:$4 sm:$0xff]  }
 0x14f   :  { %2689 = vmatprep.subr.bf16.mxu0 %v4011_v42  ;;  %v4039_v42 = vld [vmem:[#allocation4 + $0x190] ss:$8 sps:$4 sm:$0xff]  }
 0x150   :  { %1991 = vmatpush1.bf16.msra.mxu1 %v3958_v32  ;;  %v4024_v32 = vld [vmem:[#allocation4 + $0x140] ss:$8 sps:$4 sm:$0xff]  }
 0x151   :  { %1992 = vmatprep.subr.bf16.mxu1 %v3963_v33  ;;  %v4029_v33 = vld [vmem:[#allocation4 + $0x154] ss:$8 sps:$4 sm:$0xff]  }
 0x152   :  { %2690 = vmatpush1.bf16.msra.mxu0 %v4009_v43  ;;  %v4044_v43 = vld [vmem:[#allocation4 + $0x1a4] ss:$8 sps:$4 sm:$0xff]  }
 0x153   :  { %2700 = vmatprep.subr.bf16.mxu0 %v4014_v44  ;;  %v4042_v44 = vld [vmem:[#allocation4 + $0x1a0] ss:$8 sps:$4 sm:$0xff]  }
 0x154   :  { %1993 = vmatpush1.bf16.msra.mxu1 %v3961_v7  ;;  %v4032_v7 = vld [vmem:[#allocation4 + $0x164] ss:$8 sps:$4 sm:$0xff]  }
 0x155   :  { %3521 = vmatprep.subr.bf16.mxu1 %v4183_v23 }
 0x157   :  { %3385 = vmatmul.mubr.msk.bf16.vlgmr.msra.gmra.mrb[12].mxu1 %vm1531_vm0, %v4326_v63 }
 0x158   :  { %3537 = vmatprep.mubr.msk.bf16.mxu1 %vm4184_vm1, %v4183_v23 }
 0x15b   :  { %v4349_v52 = vpop.f32.mrb[4].mxu0 }
 0x15c   :  { %v4351_v39 = vpop.f32.mrb[5].mxu0 }
 0x15d   :  { %v1778_v41 = vpop.f32.mrb[6].mxu0 }
 0x15e   :  { %v1779_v20 = vpop.f32.mrb[7].mxu0  ;;  %v4036_v41 = vld [vmem:[#allocation4 + $0x180] ss:$8 sps:$4 sm:$0xff]  }
 0x15f   :  { %v4041_v20 = vld [vmem:[#allocation4 + $0x194] ss:$8 sps:$4 sm:$0xff]  }
 0x18a   :  { %v4353_v45 = vpop.f32.mrb[4].mxu1 }
 0x18b   :  { %v1694_v63 = vpop.f32.mrb[5].mxu1 }
 0x18c   :  { %v1696_v46 = vpop.f32.mrb[6].mxu1 }
 0x18d   :  { %v1697_v47 = vpop.f32.mrb[7].mxu1  ;;  %v4045_v46 = vld [vmem:[#allocation4 + $0x1b0] ss:$8 sps:$4 sm:$0xff]  }
 0x18e   :  { %v4050_v47 = vld [vmem:[#allocation4 + $0x1c4] ss:$8 sps:$4 sm:$0xff]  }
 0x1ab   :  { %v4355_v48 = vpop.f32.mrb[8].mxu0 }
 0x1ac   :  { %v2029_v49 = vmax.f32 %v4353_v45, %v4355_v48  ;;  %v1940_v50 = vpop.f32.mrb[9].mxu0  ;;  %v4068_v45 = vld [vmem:[#allocation4 + $0x224] ss:$8 sps:$4 sm:$0xff]  }
 0x1ad   :  { %v2030_v51 = vmax.f32 %v1694_v63, %v1940_v50  ;;  %v1942_v53 = vpop.f32.mrb[10].mxu0  ;;  %v4047_v63 = vld [vmem:[#allocation4 + $0x1b4] ss:$8 sps:$4 sm:$0xff]   ;;  %v4048_v50 = vld [vmem:[#allocation4 + $0x1c0] ss:$8 sps:$4 sm:$0xff]  }
 0x1ae   :  { %v1943_v54 = vpop.f32.mrb[11].mxu0  ;;  %v4053_v53 = vld [vmem:[#allocation4 + $0x1d4] ss:$8 sps:$4 sm:$0xff]  }
 0x1af   :  { %v2068_v5 = vadd.f32 %v2050_v61, %v2030_v51  ;;  %v2045_v51 = vsub.s32 2, %v4359_v56  ;;  %v4051_v54 = vld [vmem:[#allocation4 + $0x1d0] ss:$8 sps:$4 sm:$0xff]   ;;  %v4059_v61 = vld [vmem:[#allocation4 + $0x1f4] ss:$8 sps:$4 sm:$0xff]  }
 0x1b1   :  { %v2074_v15 = vmax.f32 %v2068_v5, 0.0  ;;  %v2046_v55 = vrot.slane %v4365_v58, %v2045_v51  ;;  %v4065_v5 = vld [vmem:[#allocation4 + $0x214] ss:$8 sps:$4 sm:$0xff]   ;;  %v3482_v51 = vld [vmem:[%s4487_s4] ss:$0 sm:$0xff] }
 0x1b3   :  { %v2080_v22 = vpack.c.bf16 %v2074_v15, %v2074_v15  ;;  %v2067_v60 = vadd.f32 %v2046_v55, %v2029_v49 }
 0x1da   :  { %v1856_v1 = vpop.f32.mrb[8].mxu1 }
 0x1db   :  { %v2027_v3 = vmax.f32 %v4340_v10, %v1856_v1  ;;  %v1858_v4 = vpop.f32.mrb[9].mxu1  ;;  %v4108_v10 = vld [vmem:[%s4488_s5] sm:$0xff]   ;;  %v2073_v1 = vmax.f32 %v2067_v60, 0.0 }
 0x1dc   :  { %v2028_v6 = vmax.f32 %v4343_v12, %v1858_v4  ;;  %v1860_v8 = vpop.f32.mrb[10].mxu1  ;;  %v4015_v12 = vld [vmem:[#allocation4 + $0x110] ss:$8 sps:$4 sm:$0xff]   ;;  %3522 = vmatpush3.bf16.msra.mxu1 %v4108_v10  ;;  %v4116_v60 = vld [vmem:[%s4492_s9] sm:$0xff]  }
 0x1dd   :  { %v2065_v9 = vadd.f32 %v2038_v62, %v2027_v3  ;;  %v1861_v11 = vpop.f32.mrb[11].mxu1  ;;  %3523 = vmatprep.subr.bf16.mxu1 %v4183_v23  ;;  %v4057_v62 = vld [vmem:[#allocation4 + $0x1f0] ss:$8 sps:$4 sm:$0xff]   ;;  %v4060_v3 = vld [vmem:[#allocation4 + $0x200] ss:$8 sps:$4 sm:$0xff]   ;;  %v2079_v4 = vpack.c.bf16 %v2073_v1, %v2073_v1  ;;  %v2057_v8 = vsub.s32 5, %v4359_v56 }
 0x1de   :  { %v2066_v13 = vadd.f32 %v2042_v2, %v2028_v6  ;;  %v4062_v2 = vld [vmem:[#allocation4 + $0x204] ss:$8 sps:$4 sm:$0xff]   ;;  %v4063_v6 = vld [vmem:[#allocation4 + $0x210] ss:$8 sps:$4 sm:$0xff]  }
 0x1df   :  { %v2071_v14 = vmax.f32 %v2065_v9, 0.0  ;;  %v2058_v49 = vrot.slane %v4365_v58, %v2057_v8  ;;  %v4066_v9 = vld [vmem:[#allocation4 + $0x220] ss:$8 sps:$4 sm:$0xff]   ;;  %v4118_v1 = vld [vmem:[%s4492_s9 + $0x10] sm:$0xff]  }
 0x1e0   :  { %v2072_v16 = vmax.f32 %v2066_v13, 0.0  ;;  %3524 = vmatpush3.bf16.msra.mxu1 %v4109_v25  ;;  %v4080_v25 = vld [vmem:[#allocation4 + $0x264] ss:$8 sps:$4 sm:$0xff]  }
 0x1e1   :  { %v2077_v19 = vpack.c.bf16 %v2071_v14, %v2071_v14  ;;  %3525 = vmatprep.subr.bf16.mxu1 %v4183_v23  ;;  %v4071_v14 = vld [vmem:[#allocation4 + $0x234] ss:$8 sps:$4 sm:$0xff]  }
 0x1e2   :  { %v2078_v17 = vpack.c.bf16 %v2072_v16, %v2072_v16 }
 0x1e4   :  { %2691 = vmatprep.mubr.bf16.mxu0 %v2078_v17  ;;  %3526 = vmatpush3.bf16.msra.mxu1 %v4110_v28  ;;  %v4086_v28 = vld [vmem:[#allocation4 + $0x284] ss:$8 sps:$4 sm:$0xff]  }
 0x1e5   :  { %2692 = vmatmul.mubr.bf16.vlgmr.msra.gmra.mrb[12].mxu0 %v2077_v19  ;;  %3527 = vmatprep.subr.bf16.mxu1 %v4183_v23  ;;  %v4069_v19 = vld [vmem:[#allocation4 + $0x230] ss:$8 sps:$4 sm:$0xff]  }
 0x1e6   :  { %2701 = vmatpush1.bf16.msra.mxu0 %v4012_v18  ;;  %2732 = vmatprep.mubr.bf16.mxu0 %v2080_v22 }
 0x1e7   :  { %2702 = vmatprep.subr.bf16.mxu0 %v4017_v21  ;;  %v4074_v21 = vld [vmem:[#allocation4 + $0x244] ss:$8 sps:$4 sm:$0xff]  }
 0x1e8   :  { %3528 = vmatpush3.bf16.msra.mxu1 %v4111_v31  ;;  %v4087_v31 = vld [vmem:[#allocation4 + $0x290] ss:$8 sps:$4 sm:$0xff]  }
 0x1e9   :  { %3529 = vmatprep.subr.bf16.mxu1 %v4183_v23 }
 0x1ea   :  { %2703 = vmatpush1.bf16.msra.mxu0 %v4015_v12  ;;  %v4072_v12 = vld [vmem:[#allocation4 + $0x240] ss:$8 sps:$4 sm:$0xff]  }
 0x1eb   :  { %2704 = vmatprep.subr.bf16.mxu0 %v4020_v24  ;;  %v4077_v24 = vld [vmem:[#allocation4 + $0x254] ss:$8 sps:$4 sm:$0xff]  }
 0x1ec   :  { %3530 = vmatpush3.bf16.msra.mxu1 %v4112_v34  ;;  %v4095_v34 = vld [vmem:[#allocation4 + $0x2b4] ss:$8 sps:$4 sm:$0xff]  }
 0x1ed   :  { %3531 = vmatprep.subr.bf16.mxu1 %v4183_v23 }
 0x1ee   :  { %2705 = vmatpush1.bf16.msra.mxu0 %v4018_v26  ;;  %v4083_v26 = vld [vmem:[#allocation4 + $0x274] ss:$8 sps:$4 sm:$0xff]  }
 0x1ef   :  { %2706 = vmatprep.subr.bf16.mxu0 %v4023_v27  ;;  %v4081_v27 = vld [vmem:[#allocation4 + $0x270] ss:$8 sps:$4 sm:$0xff]  }
 0x1f0   :  { %3532 = vmatpush3.bf16.msra.mxu1 %v4113_v36  ;;  %v4096_v36 = vld [vmem:[#allocation4 + $0x2c0] ss:$8 sps:$4 sm:$0xff]  }
 0x1f1   :  { %3533 = vmatprep.subr.bf16.mxu1 %v4183_v23 }
 0x1f2   :  { %2707 = vmatpush1.bf16.msra.mxu0 %v4021_v29  ;;  %v4084_v29 = vld [vmem:[#allocation4 + $0x280] ss:$8 sps:$4 sm:$0xff]  }
 0x1f3   :  { %2708 = vmatprep.subr.bf16.mxu0 %v4026_v30  ;;  %v4089_v30 = vld [vmem:[#allocation4 + $0x294] ss:$8 sps:$4 sm:$0xff]  }
 0x1f6   :  { %2709 = vmatpush1.bf16.msra.mxu0 %v4024_v32  ;;  %v4092_v32 = vld [vmem:[#allocation4 + $0x2a4] ss:$8 sps:$4 sm:$0xff]  }
 0x1f7   :  { %2710 = vmatprep.subr.bf16.mxu0 %v4029_v33  ;;  %v4090_v33 = vld [vmem:[#allocation4 + $0x2a0] ss:$8 sps:$4 sm:$0xff]  }
 0x1fa   :  { %2711 = vmatpush1.bf16.msra.mxu0 %v4027_v35  ;;  %v4093_v35 = vld [vmem:[#allocation4 + $0x2b0] ss:$8 sps:$4 sm:$0xff]  }
 0x1fb   :  { %2712 = vmatprep.subr.bf16.mxu0 %v4032_v7  ;;  %v4098_v7 = vld [vmem:[#allocation4 + $0x2c4] ss:$8 sps:$4 sm:$0xff]  }
 0x1fe   :  { %2713 = vmatpush1.bf16.msra.mxu0 %v4030_v0  ;;  %v2053_v0 = vsub.s32 4, %v4359_v56  ;;  %v4114_v56 = vld [vmem:[%s4488_s5 + $0x30] sm:$0xff]  }
 0x1ff   :  { %2714 = vmatprep.subr.bf16.mxu0 %v4035_v37  ;;  %v4101_v37 = vld [vmem:[#allocation4 + $0x2d4] ss:$8 sps:$4 sm:$0xff]   ;;  %3534 = vmatpush3.bf16.msra.mxu1 %v4114_v56 }
 0x200   :  { %3535 = vmatprep.subr.bf16.mxu1 %v4183_v23 }
 0x202   :  { %2715 = vmatpush1.bf16.msra.mxu0 %v4033_v38  ;;  %v4099_v38 = vld [vmem:[#allocation4 + $0x2d0] ss:$8 sps:$4 sm:$0xff]  }
 0x203   :  { %2716 = vmatprep.subr.bf16.mxu0 %v4038_v40  ;;  %v2054_v40 = vrot.slane %v4365_v58, %v2053_v0  ;;  %v4115_v58 = vld [vmem:[%s4488_s5 + $0x38] sm:$0xff]  }
 0x204   :  { %3536 = vmatpush3.bf16.msra.mxu1 %v4115_v58 }
 0x205   :  { %3541 = vmatprep.subr.bf16.mxu1 %v4183_v23 }
 0x206   :  { %2717 = vmatpush1.bf16.msra.mxu0 %v4036_v41  ;;  %v4104_v41 = vld [vmem:[#allocation4 + $0x2e4] ss:$8 sps:$4 sm:$0xff]  }
 0x207   :  { %2718 = vmatprep.subr.bf16.mxu0 %v4041_v20  ;;  %v4102_v20 = vld [vmem:[#allocation4 + $0x2e0] ss:$8 sps:$4 sm:$0xff]  }
 0x20a   :  { %2719 = vmatpush1.bf16.msra.mxu0 %v4039_v42 }
 0x20b   :  { %2720 = vmatprep.subr.bf16.mxu0 %v4044_v43  ;;  %v4107_v43 = vld [vmem:[#allocation4 + $0x2f4] ss:$8 sps:$4 sm:$0xff]  }
 0x20e   :  { %2721 = vmatpush1.bf16.msra.mxu0 %v4042_v44  ;;  %v4105_v44 = vld [vmem:[#allocation4 + $0x2f0] ss:$8 sps:$4 sm:$0xff]  }
 0x20f   :  { %2722 = vmatprep.subr.bf16.mxu0 %v4047_v63 }
 0x212   :  { %2723 = vmatpush1.bf16.msra.mxu0 %v4045_v46 }
 0x213   :  { %2724 = vmatprep.subr.bf16.mxu0 %v4050_v47 }
 0x216   :  { %2725 = vmatpush1.bf16.msra.mxu0 %v4048_v50 }
 0x217   :  { %2726 = vmatprep.subr.bf16.mxu0 %v4053_v53 }
 0x21a   :  { %2727 = vmatpush1.bf16.msra.mxu0 %v4051_v54 }
 0x21b   :  { %2728 = vmatprep.subr.bf16.mxu0 %v4056_v57 }
 0x21e   :  { %2729 = vmatpush1.bf16.msra.mxu0 %v4054_v59 }
 0x21f   :  { %2730 = vmatprep.subr.bf16.mxu0 %v4059_v61 }
 0x222   :  { %2731 = vmatpush1.bf16.msra.mxu0 %v4057_v62  ;;  %v4117_v62 = vld [vmem:[%s4492_s9 + $0x8] sm:$0xff]  }
 0x223   :  { %2741 = vmatprep.subr.bf16.mxu0 %v4062_v2  ;;  %v4119_v2 = vld [vmem:[%s4492_s9 + $0x18] ss:$0 sps:$4 sm:$0x11]  }
 0x225   :  { %2733 = vmatmul.mubr.bf16.vlgmr.msra.gmra.mrb[12].mxu0 %v2079_v4  ;;  %v3483_v4 = vld [vmem:[%s4489_s6] ss:$0 sm:$0xff] }
 0x226   :  { %2742 = vmatpush1.bf16.msra.mxu0 %v4060_v3  ;;  %v2963_v3 = vsel %vm2961_vm2, %v4119_v2, 0 }
 0x227   :  { %2743 = vmatprep.subr.bf16.mxu0 %v4065_v5 }
 0x22a   :  { %2744 = vmatpush1.bf16.msra.mxu0 %v4063_v6  ;;  %v4409_v48 = vpop.f32.mrb[12].mxu1 }
 0x22b   :  { %v2031_v11 = vmax.f32 %v4349_v52, %v4409_v48  ;;  %v2022_v13 = vpop.f32.mrb[13].mxu1  ;;  %2745 = vmatprep.subr.bf16.mxu0 %v4068_v45  ;;  %v4075_v52 = vld [vmem:[#allocation4 + $0x250] ss:$8 sps:$4 sm:$0xff]   ;;  %v3492_v45 = vld [vmem:[%s4490_s7] ss:$0 sm:$0xff] }
 0x22c   :  { %v2032_v15 = vmax.f32 %v4351_v39, %v2022_v13  ;;  %v2024_v16 = vpop.f32.mrb[14].mxu1  ;;  %v4078_v39 = vld [vmem:[#allocation4 + $0x260] ss:$8 sps:$4 sm:$0xff]  }
 0x22d   :  { %v2025_v17 = vpop.f32.mrb[15].mxu1  ;;  %v2069_v42 = vadd.f32 %v2054_v40, %v2031_v11  ;;  %v3493_v11 = vld [vmem:[%s4491_s8] ss:$0 sm:$0xff] }
 0x22e   :  { %v2070_v18 = vadd.f32 %v2058_v49, %v2032_v15  ;;  %2746 = vmatpush1.bf16.msra.mxu0 %v4066_v9  ;;  %v4120_v16 = vld [vmem:[%s4496_s13] sm:$0x1f]  }
 0x22f   :  { %2747 = vmatprep.subr.bf16.mxu0 %v4071_v14  ;;  %v2075_v63 = vmax.f32 %v2069_v42, 0.0  ;;  %v3043_v17 = vsel %vm3041_vm4, %v4120_v16, 0 }
 0x230   :  { %v2076_v22 = vmax.f32 %v2070_v18, 0.0  ;;  %v3494_v18 = vld [vmem:[%s4493_s10] ss:$0 sm:$0xff] }
 0x231   :  { %v2081_v46 = vpack.c.bf16 %v2075_v63, %v2075_v63 }
 0x232   :  { %v2082_v10 = vpack.c.bf16 %v2076_v22, %v2076_v22  ;;  %2748 = vmatpush1.bf16.msra.mxu0 %v4069_v19 }
 0x233   :  { %2749 = vmatprep.subr.bf16.mxu0 %v4074_v21 }
 0x234   :  { %2773 = vmatprep.mubr.bf16.mxu0 %v2082_v10  ;;  %v3500_v10 = vld [vmem:[%s4494_s11] ss:$0 sm:$0xff]  ;;  %s4185_s11 = smov 127  }
 0x236   :  { %2750 = vmatpush1.bf16.msra.mxu0 %v4072_v12 }
 0x237   :  { %2751 = vmatprep.subr.bf16.mxu0 %v4077_v24 }
 0x23a   :  { %2752 = vmatpush1.bf16.msra.mxu0 %v4075_v52  ;;  %v3501_v52 = vld [vmem:[%s4495_s12] ss:$0 sm:$0xff] }
 0x23b   :  { %2753 = vmatprep.subr.bf16.mxu0 %v4080_v25 }
 0x23e   :  { %2754 = vmatpush1.bf16.msra.mxu0 %v4078_v39 }
 0x23f   :  { %2755 = vmatprep.subr.bf16.mxu0 %v4083_v26 }
 0x242   :  { %2756 = vmatpush1.bf16.msra.mxu0 %v4081_v27  ;;  %v3502_v27 = vld [vmem:[%s4497_s14] ss:$0 sm:$0xff]  ;;  %s4187_s14 = smov 2  }
 0x243   :  { %2757 = vmatprep.subr.bf16.mxu0 %v4086_v28 }
 0x246   :  { %2758 = vmatpush1.bf16.msra.mxu0 %v4084_v29 }
 0x247   :  { %2759 = vmatprep.subr.bf16.mxu0 %v4089_v30 }
 0x24a   :  { %2760 = vmatpush1.bf16.msra.mxu0 %v4087_v31 }
 0x24b   :  { %2761 = vmatprep.subr.bf16.mxu0 %v4092_v32 }
 0x24e   :  { %2762 = vmatpush1.bf16.msra.mxu0 %v4090_v33 }
 0x24f   :  { %2763 = vmatprep.subr.bf16.mxu0 %v4095_v34 }
 0x252   :  { %2764 = vmatpush1.bf16.msra.mxu0 %v4093_v35 }
 0x253   :  { %2765 = vmatprep.subr.bf16.mxu0 %v4098_v7 }
 0x256   :  { %2766 = vmatpush1.bf16.msra.mxu0 %v4096_v36 }
 0x257   :  { %2767 = vmatprep.subr.bf16.mxu0 %v4101_v37 }
 0x25a   :  { %2768 = vmatpush1.bf16.msra.mxu0 %v4099_v38 }
 0x25b   :  { %2769 = vmatprep.subr.bf16.mxu0 %v4104_v41 }
 0x25e   :  { %2770 = vmatpush1.bf16.msra.mxu0 %v4102_v20 }
 0x25f   :  { %2771 = vmatprep.subr.bf16.mxu0 %v4107_v43 }
 0x262   :  { %2772 = vmatpush1.bf16.msra.mxu0 %v4105_v44 }
 0x265   :  { %2774 = vmatmul.mubr.bf16.vlgmr.msra.gmra.mrb[12].mxu0 %v2081_v46 }
 0x338   :  { %v2775_v47 = vpop.f32.mrb[12].mxu0 }
 0x339   :  { %v2777_v50 = vpop.f32.mrb[13].mxu0 }
 0x33a   :  { %v2782_v53 = vmax.f32 %v2775_v47, %v2777_v50  ;;  %v2779_v54 = vpop.f32.mrb[14].mxu0 }
 0x33b   :  { %v2780_v55 = vpop.f32.mrb[15].mxu0 }
 0x33c   :  { %v2790_v57 = vadd.f32 %v3482_v51, %v2782_v53 }
 0x33e   :  { %v2791_v59 = vmax.f32 %v2790_v57, 0.0 }
 0x340   :  { %v2792_v61 = vpack.c.bf16 %v2791_v59, %v2791_v59 }
 0x342   :  { %3538 = vmatmul.mubr.bf16.vlgmr.msra.gmra.mrb[16].mxu1 %v2792_v61 }
 0x343   :  { %3542 = vmatpush3.bf16.msra.mxu1 %v4116_v60  ;;  %3549 = vmatprep.mubr.msk.bf16.mxu1 %vm4184_vm1, %v4183_v23 }
 0x344   :  { %3543 = vmatprep.subr.bf16.mxu1 %v4183_v23 }
 0x347   :  { %3544 = vmatpush3.bf16.msra.mxu1 %v4117_v62 }
 0x348   :  { %3545 = vmatprep.subr.bf16.mxu1 %v4183_v23 }
 0x34b   :  { %3546 = vmatpush3.bf16.msra.mxu1 %v4118_v1 }
 0x34c   :  { %3547 = vmatprep.subr.bf16.mxu1 %v4183_v23 }
 0x34f   :  { %3548 = vmatpush3.bf16.msra.mxu1 %v2963_v3 }
 0x350   :  { %3553 = vmatprep.subr.bf16.mxu1 %v4183_v23 }
 0x415   :  { %v2898_v5 = vpop.f32.mrb[16].mxu1 }
 0x416   :  { %v2899_v6 = vadd.f32 %v3483_v4, %v2898_v5  ;;  %v3539_v8 = vpop.f32.mrb[17].mxu1 }
 0x417   :  { %v2901_v48 = vpop.f32.mrb[18].mxu1 }
 0x418   :  { %v2904_v49 = vmax.f32 %v2899_v6, 0.0  ;;  %v3540_v9 = vpop.f32.mrb[19].mxu1 }
 0x41a   :  { %v2912_v13 = vmul.f32 %v3492_v45, %v2904_v49 }
 0x41c   :  { %v2920_v14 = vadd.f32 %v3493_v11, %v2912_v13 }
 0x41e   :  { %v2921_v15 = vpack.c.bf16 %v2920_v14, %v2920_v14 }
 0x420   :  { %3550 = vmatmul.mubr.msk.bf16.vlgmr.msra.gmra.mrb[20].mxu1 %vm2957_vm3, %v2921_v15 }
 0x421   :  { %3555 = vmatprep.mubr.msk.bf16.mxu1 %vm4184_vm1, %v4183_v23  ;;  %3554 = vmatpush3.bf16.msra.mxu1 %v3043_v17 }
 0x4f3   :  { %v2999_v19 = vpop.f32.mrb[20].mxu1 }
 0x4f4   :  { %v3000_v21 = vadd.f32 %v3494_v18, %v2999_v19  ;;  %v3551_v22 = vpop.f32.mrb[21].mxu1 }
 0x4f5   :  { %v3002_v12 = vpop.f32.mrb[22].mxu1 }
 0x4f6   :  { %v3005_v23 = vmax.f32 %v3000_v21, 0.0  ;;  %v3552_v24 = vpop.f32.mrb[23].mxu1 }
 0x4f8   :  { %v3013_v25 = vmul.f32 %v3500_v10, %v3005_v23 }
 0x4fa   :  { %v3021_v39 = vadd.f32 %v3501_v52, %v3013_v25 }
 0x4fc   :  { %v3022_v26 = vpack.c.bf16 %v3021_v39, %v3021_v39 }
 0x4fe   :  { %3556 = vmatmul.mubr.msk.bf16.vlgmr.msra.gmra.mrb[24].mxu1 %vm3037_vm5, %v3022_v26 }
 0x5d1   :  { %v3079_v28 = vpop.f32.mrb[24].mxu1 }
 0x5d2   :  { %v3080_v29 = vadd.f32 %v3502_v27, %v3079_v28  ;;  %v3557_v30 = vpop.f32.mrb[25].mxu1 }
 0x5d3   :  { %v3082_v31 = vpop.f32.mrb[26].mxu1 }
 0x5d4   :  { %v3085_v32 = vmax.f32 %v3080_v29, 0.0  ;;  %v3558_v33 = vpop.f32.mrb[27].mxu1 }
 0x5d6   :  { %3087 = vrot.lane.b32.xlu0 %v3085_v32, %s4185_s11  ;;  %3112 = vst.msk [vmem:[%s4498_s15] sm:$0xff] %vm3111_vm6, %v3085_v32 }
 0x648   :  { %v3088_v34 = vpop.permute.xlu0 %3087 }
 0x649   :  { %v3090_v35 = vmax.f32 %v3085_v32, %v3088_v34 }
 0x64b   :  { %3095 = vrot.lane.b32.xlu0 %v3090_v35, %s4186_s21  ;;  %v3091_v38 = vsub.f32 %v3085_v32, %v3090_v35 }
 0x64d   :  { %v3092_v40 = vmul.f32 1.442695, %v3091_v38 }
 0x6bd   :  { %v3096_v7 = vpop.permute.xlu0 %3095 }
 0x6be   :  { %v3098_v36 = vsub.f32 %v3085_v32, %v3096_v7 }
 0x6c0   :  { %v3099_v0 = vmul.f32 1.442695, %v3098_v36 }
 0x6c2   :  { %4121 = vpow2.f32 %v3099_v0 }
 0x6c3   :  { %4123 = vpow2.f32 %v3092_v40 }
 0x6cc   :  { %v4122_v37 = vpop.eup %4121 }
 0x6cd   :  { %3102 = vrot.lane.b32.xlu1 %v4122_v37, %s4185_s11  ;;  %v4124_v41 = vpop.eup %4123 }
 0x73f   :  { %v3103_v20 = vpop.permute.xlu1 %3102 }
 0x740   :  { %v3105_v42 = vadd.f32 %v4124_v41, %v3103_v20 }
 0x742   :  { %4125 = vrcp.f32 %v3105_v42 }
 0x74c   :  { %v4126_v43 = vpop.eup %4125 }
 0x74d   :  { %v3107_v44 = vmul.f32 %v4126_v43, %v3105_v42 }
 0x74f   :  { %v3108_v63 = vsub.f32 2.0, %v3107_v44 }
 0x751   :  { %v3109_v46 = vmul.f32 %v4126_v43, %v3108_v63 }
 0x753   :  { %3121 = vrot.lane.b32.xlu1 %v3109_v46, %s4186_s21  ;;  %v3113_v56 = vmul.f32 %v4124_v41, %v3109_v46 }
 0x755   :  { %3115 = vrot.lane.b32.xlu0 %v3113_v56, %s4187_s14 }
 0x7c5   :  { %v3122_v58 = vpop.permute.xlu1 %3121 }
 0x7c6   :  { %v3124_v47 = vmul.f32 %v4122_v37, %v3122_v58 }
 0x7c7   :  { %v3116_v50 = vpop.permute.xlu0 %3115 }
 0x7c8   :  { %3119 = vst.msk [vmem:[%s4498_s15] sm:$0xff] %vm3118_vm7, %v3116_v50  ;;  %3126 = vrot.lane.b32.xlu1 %v3124_v47, %s4187_s14 }
 0x83a   :  { %v3127_v51 = vpop.permute.xlu1 %3126 }
 0x83b   :  { %3130 = vst.msk [vmem:[%s4498_s15] sm:$0xff] %vm3129_vm8, %v3127_v51 }
 0x83c   :  { %3135 = vsyncpa [#allocation3], 1 }
 0x83d   :  { %3136 = vsyncpa [#allocation5], 1 }

</bundles_post_ra>
